<compile_context>
chip_gen: v7x
topology: tpu7x:2x2x1
jax: 0.10.0
libtpu: 0.0.40
codegen_flags: <defaults>
</compile_context>

<pallas_src>
import functools

import jax
import jax.numpy as jnp
from jax.experimental import pallas as pl
from jax.experimental.pallas import tpu as pltpu


def _layer_norm(x, w, b, eps):
    # x: (S, D) f32, w/b: (1, D) f32
    mu = jnp.mean(x, axis=-1, keepdims=True)
    xc = x - mu
    var = jnp.mean(xc * xc, axis=-1, keepdims=True)
    return xc * jax.lax.rsqrt(var + eps) * w + b


def _clip_encoder_layer_kernel(
    x_ref,
    ln1_w_ref, ln1_b_ref,
    wqkv_ref, bqkv_ref,
    wo_ref, bo_ref,
    ln2_w_ref, ln2_b_ref,
    w1_ref, b1_ref, w2_ref, b2_ref,
    out_ref,
    ctx_ref,
    *, num_heads, eps):
    """One CLIPEncoderLayer for one batch element (full sequence in VMEM)."""
    _, S, D = x_ref.shape
    hd = D // num_heads
    f32 = jnp.float32
    bf16 = jnp.bfloat16

    x = x_ref[0].astype(f32)                          # (S, D) residual stream

    # ---- LayerNorm 1 ----
    h = _layer_norm(x, ln1_w_ref[...], ln1_b_ref[...], eps)

    # ---- Fused QKV projection (softmax scale pre-folded into q columns) ----
    qkv = jnp.dot(h.astype(bf16), wqkv_ref[...],
                  preferred_element_type=f32) + bqkv_ref[...]     # (S, 3D)
    qkv_b = qkv.astype(bf16)

    # ---- Per-head attention; contexts go into a (S, D) bf16 scratch ----
    for hi in range(num_heads):
        lo = hi * hd
        qh = qkv_b[:, lo:lo + hd]                     # (S, hd), already scaled
        kh = qkv_b[:, D + lo:D + lo + hd]
        vh = qkv_b[:, 2 * D + lo:2 * D + lo + hd]
        # q @ k^T via dot_general contraction on the head dim (no transpose op)
        s = jax.lax.dot_general(qh, kh, (((1,), (1,)), ((), ())),
                                preferred_element_type=f32)       # (S, S)
        m = jnp.max(s, axis=-1, keepdims=True)
        e = jnp.exp(s - m)
        l = jnp.sum(e, axis=-1, keepdims=True)        # l >= 1, approx recip OK
        p = (e * pl.reciprocal(l, approx=True)).astype(bf16)
        ctx = jnp.dot(p, vh, preferred_element_type=f32)          # (S, hd)
        ctx_ref[:, lo:lo + hd] = ctx.astype(bf16)

    # ---- Single full-depth out-projection ----
    attn = jnp.dot(ctx_ref[...], wo_ref[...],
                   preferred_element_type=f32) + bo_ref[...]
    x = x + attn

    # ---- LayerNorm 2 + MLP (quick_gelu, numerically stable sigmoid) ----
    h = _layer_norm(x, ln2_w_ref[...], ln2_b_ref[...], eps)
    h1 = jnp.dot(h.astype(bf16), w1_ref[...],
                 preferred_element_type=f32) + b1_ref[...]
    z = 1.702 * h1
    ez = jnp.exp(-jnp.abs(z))                         # in (0, 1], never inf
    r = pl.reciprocal(1.0 + ez, approx=True)
    sig = jnp.where(z >= 0, r, ez * r)
    h1 = h1 * sig
    h2 = jnp.dot(h1.astype(bf16), w2_ref[...],
                 preferred_element_type=f32) + b2_ref[...]
    x = x + h2

    out_ref[0] = x.astype(out_ref.dtype)              # single full-tile store


def prepare_layer_params(p, *, num_heads):
    """One-time parameter prep (outside the jitted forward): fuse QKV (folding
    the softmax scale into q), cast GEMM weights to bf16, reshape 1-D biases /
    LN params to (1, N) f32."""
    D = p["wq"].shape[0]
    inter = p["w1"].shape[1]
    hd = D // num_heads
    scale = hd ** -0.5
    f32, bf16 = jnp.float32, jnp.bfloat16

    def row(a, n):
        return jnp.asarray(a, f32).reshape(1, n)

    wqkv = jnp.concatenate(
        [jnp.asarray(p["wq"], f32) * scale,
         jnp.asarray(p["wk"], f32),
         jnp.asarray(p["wv"], f32)], axis=1).astype(bf16)          # (D, 3D)
    bqkv = jnp.concatenate(
        [jnp.asarray(p["bq"], f32) * scale,
         jnp.asarray(p["bk"], f32),
         jnp.asarray(p["bv"], f32)]).reshape(1, 3 * D)             # (1, 3D)

    return dict(
        ln1_w=row(p["ln1_w"], D), ln1_b=row(p["ln1_b"], D),
        wqkv=wqkv, bqkv=bqkv,
        wo=jnp.asarray(p["wo"], bf16), bo=row(p["bo"], D),
        ln2_w=row(p["ln2_w"], D), ln2_b=row(p["ln2_b"], D),
        w1=jnp.asarray(p["w1"], bf16), b1=row(p["b1"], inter),
        w2=jnp.asarray(p["w2"], bf16), b2=row(p["b2"], D),
    )


def _clip_encoder_layer(x, p, *, num_heads, eps):
    B, S, D = x.shape
    inter = p["w1"].shape[1]
    hd = D // num_heads

    args = (x,
            p["ln1_w"], p["ln1_b"],
            p["wqkv"], p["bqkv"],
            p["wo"], p["bo"],
            p["ln2_w"], p["ln2_b"],
            p["w1"], p["b1"], p["w2"], p["b2"])

    # Grid-invariant operands (constant index_map): single-buffer them — the
    # block never changes across the batch grid, so a second buffer is waste.
    def const(shape):
        return pl.BlockSpec(shape, lambda b: (0,) * len(shape),
                            pipeline_mode=pl.Buffered(1))

    in_specs = [
        pl.BlockSpec((1, S, D), lambda b: (b, 0, 0)),     # activations (2-buf)
        const((1, D)), const((1, D)),                     # ln1
        const((D, 3 * D)), const((1, 3 * D)),             # fused qkv
        const((D, D)), const((1, D)),                     # out proj
        const((1, D)), const((1, D)),                     # ln2
        const((D, inter)), const((1, inter)),             # fc1
        const((inter, D)), const((1, D)),                 # fc2
    ]

    kernel = functools.partial(_clip_encoder_layer_kernel,
                               num_heads=num_heads, eps=eps)

    # VMEM budget: single-buffered bf16 weights + double-buffered activation
    # tiles + f32 intermediates + scratch, with headroom; clamp to [32, 64] MiB
    # so the limit is valid on every chip (v7x has 64 MiB physical per core).
    weight_bytes = 2 * (4 * D * D + 2 * D * inter)
    act_bytes = 2 * 2 * S * D * 4
    tmp_bytes = 4 * S * (3 * D + inter + 6 * D) + 4 * S * S + 2 * S * D
    vmem_limit = int(1.5 * (weight_bytes + act_bytes + tmp_bytes))
    vmem_limit = max(32 * 1024 * 1024, min(vmem_limit, 64 * 1024 * 1024))

    flops = (2 * B * S * D * 3 * D                   # fused qkv projection
             + 2 * B * num_heads * S * S * hd * 2    # scores + context
             + 2 * B * S * D * D                     # out projection
             + 2 * B * S * D * inter * 2)            # fc1 + fc2
    transcendentals = B * num_heads * S * S + B * S * inter
    bytes_accessed = 2 * B * S * D * x.dtype.itemsize + weight_bytes

    return pl.pallas_call(
        kernel,
        out_shape=jax.ShapeDtypeStruct((B, S, D), x.dtype),
        grid_spec=pltpu.PrefetchScalarGridSpec(
            num_scalar_prefetch=0,
            grid=(B,),
            in_specs=in_specs,
            out_specs=pl.BlockSpec((1, S, D), lambda b: (b, 0, 0)),
            scratch_shapes=[pltpu.VMEM((S, D), jnp.bfloat16)],
        ),
        compiler_params=pltpu.CompilerParams(
            dimension_semantics=("parallel",),
            vmem_limit_bytes=vmem_limit),
        cost_estimate=pl.CostEstimate(
            flops=flops, transcendentals=transcendentals,
            bytes_accessed=bytes_accessed),
    )(*args)


@functools.partial(jax.jit,
                   static_argnames=("num_heads", "eps",
                                    "return_all_hidden_states"))
def clip_encoder(inputs_embeds, layer_params, *, num_heads, eps=1e-5,
                 return_all_hidden_states=False):
    """inputs_embeds: [B, S, D]; layer_params: tuple of prepared per-layer
    dicts (see prepare_layer_params)."""
    hidden_states = inputs_embeds
    pool = [hidden_states]
    for p in layer_params:
        hidden_states = _clip_encoder_layer(hidden_states, p,
                                            num_heads=num_heads, eps=eps)
        pool.append(hidden_states)
    if return_all_hidden_states:
        return pool
    return hidden_states


def _reference(inputs_embeds, layer_params, num_heads, eps):
    """Pure-JAX f32 reference matching the PyTorch forward (tp=1), on RAW
    (unprepared) parameters."""
    B, S, D = inputs_embeds.shape
    hd = D // num_heads
    scale = hd ** -0.5

    def ln(v, w, b):
        mu = jnp.mean(v, axis=-1, keepdims=True)
        var = jnp.mean((v - mu) ** 2, axis=-1, keepdims=True)
        return (v - mu) / jnp.sqrt(var + eps) * w + b

    h = inputs_embeds.astype(jnp.float32)
    for p in layer_params:
        residual = h
        y = ln(h, p["ln1_w"], p["ln1_b"])
        q = (y @ p["wq"] + p["bq"]).reshape(B, S, num_heads, hd)
        k = (y @ p["wk"] + p["bk"]).reshape(B, S, num_heads, hd)
        v = (y @ p["wv"] + p["bv"]).reshape(B, S, num_heads, hd)
        scores = jnp.einsum("bqhd,bkhd->bhqk", q, k) * scale
        probs = jax.nn.softmax(scores, axis=-1)
        ctx = jnp.einsum("bhqk,bkhd->bqhd", probs, v).reshape(B, S, D)
        attn = ctx @ p["wo"] + p["bo"]
        h = residual + attn
        residual = h
        y = ln(h, p["ln2_w"], p["ln2_b"])
        y = y @ p["w1"] + p["b1"]
        y = y * jax.nn.sigmoid(1.702 * y)          # quick_gelu (CLIP default)
        y = y @ p["w2"] + p["b2"]
        h = residual + y
    return h


if __name__ == "__main__":
    # Small CLIP-like config: batch=2, seq=8, hidden=32, 4 heads, mlp=64, 2 layers.
    B, S, D = 2, 8, 32
    num_heads = 4
    intermediate = 64
    num_layers = 2
    eps = 1e-5

    key = jax.random.PRNGKey(0)
    key, kx = jax.random.split(key)
    inputs_embeds = jax.random.normal(kx, (B, S, D), dtype=jnp.float32)

    def make_layer(k):
        ks = jax.random.split(k, 16)
        n = jax.random.normal
        return dict(
            ln1_w=1.0 + 0.05 * n(ks[0], (D,), dtype=jnp.float32),
            ln1_b=0.05 * n(ks[1], (D,), dtype=jnp.float32),
            wq=0.05 * n(ks[2], (D, D), dtype=jnp.float32),
            bq=0.02 * n(ks[3], (D,), dtype=jnp.float32),
            wk=0.05 * n(ks[4], (D, D), dtype=jnp.float32),
            bk=0.02 * n(ks[5], (D,), dtype=jnp.float32),
            wv=0.05 * n(ks[6], (D, D), dtype=jnp.float32),
            bv=0.02 * n(ks[7], (D,), dtype=jnp.float32),
            wo=0.05 * n(ks[8], (D, D), dtype=jnp.float32),
            bo=0.02 * n(ks[9], (D,), dtype=jnp.float32),
            ln2_w=1.0 + 0.05 * n(ks[10], (D,), dtype=jnp.float32),
            ln2_b=0.05 * n(ks[11], (D,), dtype=jnp.float32),
            w1=0.05 * n(ks[12], (D, intermediate), dtype=jnp.float32),
            b1=0.02 * n(ks[13], (intermediate,), dtype=jnp.float32),
            w2=0.05 * n(ks[14], (intermediate, D), dtype=jnp.float32),
            b2=0.02 * n(ks[15], (D,), dtype=jnp.float32),
        )

    layer_keys = jax.random.split(key, num_layers)
    layer_params = tuple(make_layer(k) for k in layer_keys)

    # One-time parameter prep (bf16 cast, QKV fusion, bias reshape) — outside jit.
    prepared = tuple(prepare_layer_params(p, num_heads=num_heads)
                     for p in layer_params)
    prepared = jax.block_until_ready(prepared)

    out = clip_encoder(inputs_embeds, prepared, num_heads=num_heads, eps=eps)
    out = jax.block_until_ready(out)

    ref = _reference(inputs_embeds, layer_params, num_heads, eps)
    assert out.shape == (B, S, D), out.shape
    err = float(jnp.max(jnp.abs(out - ref)))
    # bf16 GEMM operands with f32 accumulation: errors stay well below 2e-2.
    assert err < 2e-2, err

    print("KERNEL_OK")
</pallas_src>

<mosaic_0001>
module attributes {stable_mosaic.version = 11 : i64} {
  func.func @_clip_encoder_layer_kernel(%arg0: i32, %arg1: memref<1x8x32xf32, #tpu.memory_space<vmem>>, %arg2: memref<1x32xf32, #tpu.memory_space<vmem>>, %arg3: memref<1x32xf32, #tpu.memory_space<vmem>>, %arg4: memref<32x96xbf16, #tpu.memory_space<vmem>>, %arg5: memref<1x96xf32, #tpu.memory_space<vmem>>, %arg6: memref<32x32xbf16, #tpu.memory_space<vmem>>, %arg7: memref<1x32xf32, #tpu.memory_space<vmem>>, %arg8: memref<1x32xf32, #tpu.memory_space<vmem>>, %arg9: memref<1x32xf32, #tpu.memory_space<vmem>>, %arg10: memref<32x64xbf16, #tpu.memory_space<vmem>>, %arg11: memref<1x64xf32, #tpu.memory_space<vmem>>, %arg12: memref<64x32xbf16, #tpu.memory_space<vmem>>, %arg13: memref<1x32xf32, #tpu.memory_space<vmem>>, %arg14: memref<1x8x32xf32, #tpu.memory_space<vmem>>, %arg15: memref<8x32xbf16, #tpu.memory_space<vmem>>) attributes {dimension_semantics = [#tpu.dimension_semantics<parallel>], iteration_bounds = array<i64: 2>, scalar_prefetch = 0 : i64, scratch_operands = 1 : i64, tpu.core_type = #tpu.core_type<tc>, window_params = [{transform_indices = @transform_0, window_bounds = array<i64: 1, 8, 32>}, {pipeline_mode = #tpu.pipeline_mode<synchronous>, transform_indices = @transform_1, window_bounds = array<i64: 1, 32>}, {pipeline_mode = #tpu.pipeline_mode<synchronous>, transform_indices = @transform_2, window_bounds = array<i64: 1, 32>}, {pipeline_mode = #tpu.pipeline_mode<synchronous>, transform_indices = @transform_3, window_bounds = array<i64: 32, 96>}, {pipeline_mode = #tpu.pipeline_mode<synchronous>, transform_indices = @transform_4, window_bounds = array<i64: 1, 96>}, {pipeline_mode = #tpu.pipeline_mode<synchronous>, transform_indices = @transform_5, window_bounds = array<i64: 32, 32>}, {pipeline_mode = #tpu.pipeline_mode<synchronous>, transform_indices = @transform_6, window_bounds = array<i64: 1, 32>}, {pipeline_mode = #tpu.pipeline_mode<synchronous>, transform_indices = @transform_7, window_bounds = array<i64: 1, 32>}, {pipeline_mode = #tpu.pipeline_mode<synchronous>, transform_indices = @transform_8, window_bounds = array<i64: 1, 32>}, {pipeline_mode = #tpu.pipeline_mode<synchronous>, transform_indices = @transform_9, window_bounds = array<i64: 32, 64>}, {pipeline_mode = #tpu.pipeline_mode<synchronous>, transform_indices = @transform_10, window_bounds = array<i64: 1, 64>}, {pipeline_mode = #tpu.pipeline_mode<synchronous>, transform_indices = @transform_11, window_bounds = array<i64: 64, 32>}, {pipeline_mode = #tpu.pipeline_mode<synchronous>, transform_indices = @transform_12, window_bounds = array<i64: 1, 32>}, {transform_indices = @transform_13, window_bounds = array<i64: 1, 8, 32>}]} {
    %c0 = arith.constant 0 : index
    %c0_0 = arith.constant 0 : index
    %c0_1 = arith.constant 0 : index
    %0 = vector.load %arg1[%c0, %c0_0, %c0_1] : memref<1x8x32xf32, #tpu.memory_space<vmem>>, vector<1x8x32xf32>
    %1 = vector.shape_cast %0 : vector<1x8x32xf32> to vector<8x32xf32>
    %c0_2 = arith.constant 0 : index
    %c0_3 = arith.constant 0 : index
    %2 = vector.load %arg2[%c0_2, %c0_3] : memref<1x32xf32, #tpu.memory_space<vmem>>, vector<1x32xf32>
    %c0_4 = arith.constant 0 : index
    %c0_5 = arith.constant 0 : index
    %3 = vector.load %arg3[%c0_4, %c0_5] : memref<1x32xf32, #tpu.memory_space<vmem>>, vector<1x32xf32>
    %cst = arith.constant dense<0.000000e+00> : vector<8xf32>
    %4 = vector.multi_reduction <add>, %1, %cst [1] : vector<8x32xf32> to vector<8xf32>
    %5 = vector.shape_cast %4 : vector<8xf32> to vector<8x1xf32>
    %cst_6 = arith.constant 3.200000e+01 : f32
    %6 = vector.broadcast %cst_6 : f32 to vector<8x1xf32>
    %7 = arith.divf %5, %6 : vector<8x1xf32>
    %8 = vector.broadcast %7 : vector<8x1xf32> to vector<8x32xf32>
    %9 = arith.subf %1, %8 : vector<8x32xf32>
    %10 = arith.mulf %9, %9 : vector<8x32xf32>
    %cst_7 = arith.constant dense<0.000000e+00> : vector<8xf32>
    %11 = vector.multi_reduction <add>, %10, %cst_7 [1] : vector<8x32xf32> to vector<8xf32>
    %12 = vector.shape_cast %11 : vector<8xf32> to vector<8x1xf32>
    %cst_8 = arith.constant 3.200000e+01 : f32
    %13 = vector.broadcast %cst_8 : f32 to vector<8x1xf32>
    %14 = arith.divf %12, %13 : vector<8x1xf32>
    %cst_9 = arith.constant 9.99999974E-6 : f32
    %15 = vector.broadcast %cst_9 : f32 to vector<8x1xf32>
    %16 = arith.addf %14, %15 : vector<8x1xf32>
    %17 = math.rsqrt %16 : vector<8x1xf32>
    %18 = vector.broadcast %17 : vector<8x1xf32> to vector<8x32xf32>
    %19 = arith.mulf %9, %18 : vector<8x32xf32>
    %20 = vector.broadcast %2 : vector<1x32xf32> to vector<8x32xf32>
    %21 = arith.mulf %19, %20 : vector<8x32xf32>
    %22 = vector.broadcast %3 : vector<1x32xf32> to vector<8x32xf32>
    %23 = arith.addf %21, %22 : vector<8x32xf32>
    %24 = arith.truncf %23 : vector<8x32xf32> to vector<8x32xbf16>
    %c0_10 = arith.constant 0 : index
    %c0_11 = arith.constant 0 : index
    %25 = vector.load %arg4[%c0_10, %c0_11] : memref<32x96xbf16, #tpu.memory_space<vmem>>, vector<32x96xbf16>
    %cst_12 = arith.constant dense<0.000000e+00> : vector<8x96xf32>
    %26 = tpu.matmul %24, %25, %cst_12 {dimension_numbers = #tpu.dot_dimension_numbers<[1], [0], [0], [1], [0, 0, 1, 1], [], []>} : vector<8x32xbf16>, vector<32x96xbf16>, vector<8x96xf32> -> vector<8x96xf32>
    %c0_13 = arith.constant 0 : index
    %c0_14 = arith.constant 0 : index
    %27 = vector.load %arg5[%c0_13, %c0_14] : memref<1x96xf32, #tpu.memory_space<vmem>>, vector<1x96xf32>
    %28 = vector.broadcast %27 : vector<1x96xf32> to vector<8x96xf32>
    %29 = arith.addf %26, %28 : vector<8x96xf32>
    %30 = arith.truncf %29 : vector<8x96xf32> to vector<8x96xbf16>
    %31 = vector.extract_strided_slice %30 {offsets = [0, 0], sizes = [8, 8], strides = [1, 1]} : vector<8x96xbf16> to vector<8x8xbf16>
    %32 = vector.extract_strided_slice %30 {offsets = [0, 32], sizes = [8, 8], strides = [1, 1]} : vector<8x96xbf16> to vector<8x8xbf16>
    %33 = vector.extract_strided_slice %30 {offsets = [0, 64], sizes = [8, 8], strides = [1, 1]} : vector<8x96xbf16> to vector<8x8xbf16>
    %cst_15 = arith.constant dense<0.000000e+00> : vector<8x8xf32>
    %34 = tpu.matmul %31, %32, %cst_15 {dimension_numbers = #tpu.dot_dimension_numbers<[1], [1], [0], [0], [0, 0, 1, 0], [], []>} : vector<8x8xbf16>, vector<8x8xbf16>, vector<8x8xf32> -> vector<8x8xf32>
    %cst_16 = arith.constant dense<0xFF800000> : vector<8xf32>
    %35 = vector.multi_reduction <maximumf>, %34, %cst_16 [1] : vector<8x8xf32> to vector<8xf32>
    %36 = vector.shape_cast %35 : vector<8xf32> to vector<8x1xf32>
    %37 = vector.broadcast %36 : vector<8x1xf32> to vector<8x8xf32>
    %38 = arith.subf %34, %37 : vector<8x8xf32>
    %39 = math.exp %38 : vector<8x8xf32>
    %cst_17 = arith.constant dense<0.000000e+00> : vector<8xf32>
    %40 = vector.multi_reduction <add>, %39, %cst_17 [1] : vector<8x8xf32> to vector<8xf32>
    %41 = vector.shape_cast %40 : vector<8xf32> to vector<8x1xf32>
    %42 = tpu.reciprocal %41 {approx = true} : vector<8x1xf32> -> vector<8x1xf32>
    %43 = vector.broadcast %42 : vector<8x1xf32> to vector<8x8xf32>
    %44 = arith.mulf %39, %43 : vector<8x8xf32>
    %45 = arith.truncf %44 : vector<8x8xf32> to vector<8x8xbf16>
    %cst_18 = arith.constant dense<0.000000e+00> : vector<8x8xf32>
    %46 = tpu.matmul %45, %33, %cst_18 {dimension_numbers = #tpu.dot_dimension_numbers<[1], [0], [0], [1], [0, 0, 1, 1], [], []>} : vector<8x8xbf16>, vector<8x8xbf16>, vector<8x8xf32> -> vector<8x8xf32>
    %47 = arith.truncf %46 : vector<8x8xf32> to vector<8x8xbf16>
    %c0_19 = arith.constant 0 : index
    %c0_20 = arith.constant 0 : index
    %48 = vector.load %arg15[%c0_19, %c0_20] : memref<8x32xbf16, #tpu.memory_space<vmem>>, vector<8x8xbf16>
    tpu.vector_store %arg15[%c0_19, %c0_20], %47 {strides = array<i32>} : memref<8x32xbf16, #tpu.memory_space<vmem>>, vector<8x8xbf16>,
    %49 = vector.extract_strided_slice %30 {offsets = [0, 8], sizes = [8, 8], strides = [1, 1]} : vector<8x96xbf16> to vector<8x8xbf16>
    %50 = vector.extract_strided_slice %30 {offsets = [0, 40], sizes = [8, 8], strides = [1, 1]} : vector<8x96xbf16> to vector<8x8xbf16>
    %51 = vector.extract_strided_slice %30 {offsets = [0, 72], sizes = [8, 8], strides = [1, 1]} : vector<8x96xbf16> to vector<8x8xbf16>
    %cst_21 = arith.constant dense<0.000000e+00> : vector<8x8xf32>
    %52 = tpu.matmul %49, %50, %cst_21 {dimension_numbers = #tpu.dot_dimension_numbers<[1], [1], [0], [0], [0, 0, 1, 0], [], []>} : vector<8x8xbf16>, vector<8x8xbf16>, vector<8x8xf32> -> vector<8x8xf32>
    %cst_22 = arith.constant dense<0xFF800000> : vector<8xf32>
    %53 = vector.multi_reduction <maximumf>, %52, %cst_22 [1] : vector<8x8xf32> to vector<8xf32>
    %54 = vector.shape_cast %53 : vector<8xf32> to vector<8x1xf32>
    %55 = vector.broadcast %54 : vector<8x1xf32> to vector<8x8xf32>
    %56 = arith.subf %52, %55 : vector<8x8xf32>
    %57 = math.exp %56 : vector<8x8xf32>
    %cst_23 = arith.constant dense<0.000000e+00> : vector<8xf32>
    %58 = vector.multi_reduction <add>, %57, %cst_23 [1] : vector<8x8xf32> to vector<8xf32>
    %59 = vector.shape_cast %58 : vector<8xf32> to vector<8x1xf32>
    %60 = tpu.reciprocal %59 {approx = true} : vector<8x1xf32> -> vector<8x1xf32>
    %61 = vector.broadcast %60 : vector<8x1xf32> to vector<8x8xf32>
    %62 = arith.mulf %57, %61 : vector<8x8xf32>
    %63 = arith.truncf %62 : vector<8x8xf32> to vector<8x8xbf16>
    %cst_24 = arith.constant dense<0.000000e+00> : vector<8x8xf32>
    %64 = tpu.matmul %63, %51, %cst_24 {dimension_numbers = #tpu.dot_dimension_numbers<[1], [0], [0], [1], [0, 0, 1, 1], [], []>} : vector<8x8xbf16>, vector<8x8xbf16>, vector<8x8xf32> -> vector<8x8xf32>
    %65 = arith.truncf %64 : vector<8x8xf32> to vector<8x8xbf16>
    %c0_25 = arith.constant 0 : index
    %c8 = arith.constant 8 : index
    %66 = vector.load %arg15[%c0_25, %c8] : memref<8x32xbf16, #tpu.memory_space<vmem>>, vector<8x8xbf16>
    tpu.vector_store %arg15[%c0_25, %c8], %65 {strides = array<i32>} : memref<8x32xbf16, #tpu.memory_space<vmem>>, vector<8x8xbf16>,
    %67 = vector.extract_strided_slice %30 {offsets = [0, 16], sizes = [8, 8], strides = [1, 1]} : vector<8x96xbf16> to vector<8x8xbf16>
    %68 = vector.extract_strided_slice %30 {offsets = [0, 48], sizes = [8, 8], strides = [1, 1]} : vector<8x96xbf16> to vector<8x8xbf16>
    %69 = vector.extract_strided_slice %30 {offsets = [0, 80], sizes = [8, 8], strides = [1, 1]} : vector<8x96xbf16> to vector<8x8xbf16>
    %cst_26 = arith.constant dense<0.000000e+00> : vector<8x8xf32>
    %70 = tpu.matmul %67, %68, %cst_26 {dimension_numbers = #tpu.dot_dimension_numbers<[1], [1], [0], [0], [0, 0, 1, 0], [], []>} : vector<8x8xbf16>, vector<8x8xbf16>, vector<8x8xf32> -> vector<8x8xf32>
    %cst_27 = arith.constant dense<0xFF800000> : vector<8xf32>
    %71 = vector.multi_reduction <maximumf>, %70, %cst_27 [1] : vector<8x8xf32> to vector<8xf32>
    %72 = vector.shape_cast %71 : vector<8xf32> to vector<8x1xf32>
    %73 = vector.broadcast %72 : vector<8x1xf32> to vector<8x8xf32>
    %74 = arith.subf %70, %73 : vector<8x8xf32>
    %75 = math.exp %74 : vector<8x8xf32>
    %cst_28 = arith.constant dense<0.000000e+00> : vector<8xf32>
    %76 = vector.multi_reduction <add>, %75, %cst_28 [1] : vector<8x8xf32> to vector<8xf32>
    %77 = vector.shape_cast %76 : vector<8xf32> to vector<8x1xf32>
    %78 = tpu.reciprocal %77 {approx = true} : vector<8x1xf32> -> vector<8x1xf32>
    %79 = vector.broadcast %78 : vector<8x1xf32> to vector<8x8xf32>
    %80 = arith.mulf %75, %79 : vector<8x8xf32>
    %81 = arith.truncf %80 : vector<8x8xf32> to vector<8x8xbf16>
    %cst_29 = arith.constant dense<0.000000e+00> : vector<8x8xf32>
    %82 = tpu.matmul %81, %69, %cst_29 {dimension_numbers = #tpu.dot_dimension_numbers<[1], [0], [0], [1], [0, 0, 1, 1], [], []>} : vector<8x8xbf16>, vector<8x8xbf16>, vector<8x8xf32> -> vector<8x8xf32>
    %83 = arith.truncf %82 : vector<8x8xf32> to vector<8x8xbf16>
    %c0_30 = arith.constant 0 : index
    %c16 = arith.constant 16 : index
    %84 = vector.load %arg15[%c0_30, %c16] : memref<8x32xbf16, #tpu.memory_space<vmem>>, vector<8x8xbf16>
    tpu.vector_store %arg15[%c0_30, %c16], %83 {strides = array<i32>} : memref<8x32xbf16, #tpu.memory_space<vmem>>, vector<8x8xbf16>,
    %85 = vector.extract_strided_slice %30 {offsets = [0, 24], sizes = [8, 8], strides = [1, 1]} : vector<8x96xbf16> to vector<8x8xbf16>
    %86 = vector.extract_strided_slice %30 {offsets = [0, 56], sizes = [8, 8], strides = [1, 1]} : vector<8x96xbf16> to vector<8x8xbf16>
    %87 = vector.extract_strided_slice %30 {offsets = [0, 88], sizes = [8, 8], strides = [1, 1]} : vector<8x96xbf16> to vector<8x8xbf16>
    %cst_31 = arith.constant dense<0.000000e+00> : vector<8x8xf32>
    %88 = tpu.matmul %85, %86, %cst_31 {dimension_numbers = #tpu.dot_dimension_numbers<[1], [1], [0], [0], [0, 0, 1, 0], [], []>} : vector<8x8xbf16>, vector<8x8xbf16>, vector<8x8xf32> -> vector<8x8xf32>
    %cst_32 = arith.constant dense<0xFF800000> : vector<8xf32>
    %89 = vector.multi_reduction <maximumf>, %88, %cst_32 [1] : vector<8x8xf32> to vector<8xf32>
    %90 = vector.shape_cast %89 : vector<8xf32> to vector<8x1xf32>
    %91 = vector.broadcast %90 : vector<8x1xf32> to vector<8x8xf32>
    %92 = arith.subf %88, %91 : vector<8x8xf32>
    %93 = math.exp %92 : vector<8x8xf32>
    %cst_33 = arith.constant dense<0.000000e+00> : vector<8xf32>
    %94 = vector.multi_reduction <add>, %93, %cst_33 [1] : vector<8x8xf32> to vector<8xf32>
    %95 = vector.shape_cast %94 : vector<8xf32> to vector<8x1xf32>
    %96 = tpu.reciprocal %95 {approx = true} : vector<8x1xf32> -> vector<8x1xf32>
    %97 = vector.broadcast %96 : vector<8x1xf32> to vector<8x8xf32>
    %98 = arith.mulf %93, %97 : vector<8x8xf32>
    %99 = arith.truncf %98 : vector<8x8xf32> to vector<8x8xbf16>
    %cst_34 = arith.constant dense<0.000000e+00> : vector<8x8xf32>
    %100 = tpu.matmul %99, %87, %cst_34 {dimension_numbers = #tpu.dot_dimension_numbers<[1], [0], [0], [1], [0, 0, 1, 1], [], []>} : vector<8x8xbf16>, vector<8x8xbf16>, vector<8x8xf32> -> vector<8x8xf32>
    %101 = arith.truncf %100 : vector<8x8xf32> to vector<8x8xbf16>
    %c0_35 = arith.constant 0 : index
    %c24 = arith.constant 24 : index
    %102 = vector.load %arg15[%c0_35, %c24] : memref<8x32xbf16, #tpu.memory_space<vmem>>, vector<8x8xbf16>
    tpu.vector_store %arg15[%c0_35, %c24], %101 {strides = array<i32>} : memref<8x32xbf16, #tpu.memory_space<vmem>>, vector<8x8xbf16>,
    %c0_36 = arith.constant 0 : index
    %c0_37 = arith.constant 0 : index
    %103 = vector.load %arg15[%c0_36, %c0_37] : memref<8x32xbf16, #tpu.memory_space<vmem>>, vector<8x32xbf16>
    %c0_38 = arith.constant 0 : index
    %c0_39 = arith.constant 0 : index
    %104 = vector.load %arg6[%c0_38, %c0_39] : memref<32x32xbf16, #tpu.memory_space<vmem>>, vector<32x32xbf16>
    %cst_40 = arith.constant dense<0.000000e+00> : vector<8x32xf32>
    %105 = tpu.matmul %103, %104, %cst_40 {dimension_numbers = #tpu.dot_dimension_numbers<[1], [0], [0], [1], [0, 0, 1, 1], [], []>} : vector<8x32xbf16>, vector<32x32xbf16>, vector<8x32xf32> -> vector<8x32xf32>
    %c0_41 = arith.constant 0 : index
    %c0_42 = arith.constant 0 : index
    %106 = vector.load %arg7[%c0_41, %c0_42] : memref<1x32xf32, #tpu.memory_space<vmem>>, vector<1x32xf32>
    %107 = vector.broadcast %106 : vector<1x32xf32> to vector<8x32xf32>
    %108 = arith.addf %105, %107 : vector<8x32xf32>
    %109 = arith.addf %1, %108 : vector<8x32xf32>
    %c0_43 = arith.constant 0 : index
    %c0_44 = arith.constant 0 : index
    %110 = vector.load %arg8[%c0_43, %c0_44] : memref<1x32xf32, #tpu.memory_space<vmem>>, vector<1x32xf32>
    %c0_45 = arith.constant 0 : index
    %c0_46 = arith.constant 0 : index
    %111 = vector.load %arg9[%c0_45, %c0_46] : memref<1x32xf32, #tpu.memory_space<vmem>>, vector<1x32xf32>
    %cst_47 = arith.constant dense<0.000000e+00> : vector<8xf32>
    %112 = vector.multi_reduction <add>, %109, %cst_47 [1] : vector<8x32xf32> to vector<8xf32>
    %113 = vector.shape_cast %112 : vector<8xf32> to vector<8x1xf32>
    %cst_48 = arith.constant 3.200000e+01 : f32
    %114 = vector.broadcast %cst_48 : f32 to vector<8x1xf32>
    %115 = arith.divf %113, %114 : vector<8x1xf32>
    %116 = vector.broadcast %115 : vector<8x1xf32> to vector<8x32xf32>
    %117 = arith.subf %109, %116 : vector<8x32xf32>
    %118 = arith.mulf %117, %117 : vector<8x32xf32>
    %cst_49 = arith.constant dense<0.000000e+00> : vector<8xf32>
    %119 = vector.multi_reduction <add>, %118, %cst_49 [1] : vector<8x32xf32> to vector<8xf32>
    %120 = vector.shape_cast %119 : vector<8xf32> to vector<8x1xf32>
    %cst_50 = arith.constant 3.200000e+01 : f32
    %121 = vector.broadcast %cst_50 : f32 to vector<8x1xf32>
    %122 = arith.divf %120, %121 : vector<8x1xf32>
    %cst_51 = arith.constant 9.99999974E-6 : f32
    %123 = vector.broadcast %cst_51 : f32 to vector<8x1xf32>
    %124 = arith.addf %122, %123 : vector<8x1xf32>
    %125 = math.rsqrt %124 : vector<8x1xf32>
    %126 = vector.broadcast %125 : vector<8x1xf32> to vector<8x32xf32>
    %127 = arith.mulf %117, %126 : vector<8x32xf32>
    %128 = vector.broadcast %110 : vector<1x32xf32> to vector<8x32xf32>
    %129 = arith.mulf %127, %128 : vector<8x32xf32>
    %130 = vector.broadcast %111 : vector<1x32xf32> to vector<8x32xf32>
    %131 = arith.addf %129, %130 : vector<8x32xf32>
    %132 = arith.truncf %131 : vector<8x32xf32> to vector<8x32xbf16>
    %c0_52 = arith.constant 0 : index
    %c0_53 = arith.constant 0 : index
    %133 = vector.load %arg10[%c0_52, %c0_53] : memref<32x64xbf16, #tpu.memory_space<vmem>>, vector<32x64xbf16>
    %cst_54 = arith.constant dense<0.000000e+00> : vector<8x64xf32>
    %134 = tpu.matmul %132, %133, %cst_54 {dimension_numbers = #tpu.dot_dimension_numbers<[1], [0], [0], [1], [0, 0, 1, 1], [], []>} : vector<8x32xbf16>, vector<32x64xbf16>, vector<8x64xf32> -> vector<8x64xf32>
    %c0_55 = arith.constant 0 : index
    %c0_56 = arith.constant 0 : index
    %135 = vector.load %arg11[%c0_55, %c0_56] : memref<1x64xf32, #tpu.memory_space<vmem>>, vector<1x64xf32>
    %136 = vector.broadcast %135 : vector<1x64xf32> to vector<8x64xf32>
    %137 = arith.addf %134, %136 : vector<8x64xf32>
    %cst_57 = arith.constant 1.702000e+00 : f32
    %138 = vector.broadcast %cst_57 : f32 to vector<8x64xf32>
    %139 = arith.mulf %138, %137 : vector<8x64xf32>
    %140 = math.absf %139 : vector<8x64xf32>
    %cst_58 = arith.constant 0.000000e+00 : f32
    %141 = vector.broadcast %cst_58 : f32 to vector<8x64xf32>
    %142 = arith.subf %141, %140 : vector<8x64xf32>
    %143 = math.exp %142 : vector<8x64xf32>
    %cst_59 = arith.constant 1.000000e+00 : f32
    %144 = vector.broadcast %cst_59 : f32 to vector<8x64xf32>
    %145 = arith.addf %144, %143 : vector<8x64xf32>
    %146 = tpu.reciprocal %145 {approx = true} : vector<8x64xf32> -> vector<8x64xf32>
    %cst_60 = arith.constant 0.000000e+00 : f32
    %147 = vector.broadcast %cst_60 : f32 to vector<8x64xf32>
    %148 = arith.cmpf oge, %139, %147 : vector<8x64xf32>
    %149 = arith.mulf %143, %146 : vector<8x64xf32>
    %150 = arith.select %148, %146, %149 : vector<8x64xi1>, vector<8x64xf32>
    %151 = arith.mulf %137, %150 : vector<8x64xf32>
    %152 = arith.truncf %151 : vector<8x64xf32> to vector<8x64xbf16>
    %c0_61 = arith.constant 0 : index
    %c0_62 = arith.constant 0 : index
    %153 = vector.load %arg12[%c0_61, %c0_62] : memref<64x32xbf16, #tpu.memory_space<vmem>>, vector<64x32xbf16>
    %cst_63 = arith.constant dense<0.000000e+00> : vector<8x32xf32>
    %154 = tpu.matmul %152, %153, %cst_63 {dimension_numbers = #tpu.dot_dimension_numbers<[1], [0], [0], [1], [0, 0, 1, 1], [], []>} : vector<8x64xbf16>, vector<64x32xbf16>, vector<8x32xf32> -> vector<8x32xf32>
    %c0_64 = arith.constant 0 : index
    %c0_65 = arith.constant 0 : index
    %155 = vector.load %arg13[%c0_64, %c0_65] : memref<1x32xf32, #tpu.memory_space<vmem>>, vector<1x32xf32>
    %156 = vector.broadcast %155 : vector<1x32xf32> to vector<8x32xf32>
    %157 = arith.addf %154, %156 : vector<8x32xf32>
    %158 = arith.addf %109, %157 : vector<8x32xf32>
    %c0_66 = arith.constant 0 : index
    %c0_67 = arith.constant 0 : index
    %c0_68 = arith.constant 0 : index
    %159 = vector.load %arg14[%c0_66, %c0_67, %c0_68] : memref<1x8x32xf32, #tpu.memory_space<vmem>>, vector<1x8x32xf32>
    %160 = vector.shape_cast %159 : vector<1x8x32xf32> to vector<8x32xf32>
    %161 = vector.shape_cast %158 : vector<8x32xf32> to vector<1x8x32xf32>
    tpu.vector_store %arg14[%c0_66, %c0_67, %c0_68], %161 {strides = array<i32>} : memref<1x8x32xf32, #tpu.memory_space<vmem>>, vector<1x8x32xf32>,
    return
  }
  func.func @transform_0(%arg0: i32) -> (i32, i32, i32) {
    %c0_i32 = arith.constant 0 : i32
    %c0_i32_0 = arith.constant 0 : i32
    %c0_i32_1 = arith.constant 0 : i32
    return %arg0, %c0_i32, %c0_i32_0 : i32, i32, i32
  }
  func.func @transform_1(%arg0: i32) -> (i32, i32) {
    %c0_i32 = arith.constant 0 : i32
    %c0_i32_0 = arith.constant 0 : i32
    %c0_i32_1 = arith.constant 0 : i32
    return %c0_i32, %c0_i32_0 : i32, i32
  }
  func.func @transform_2(%arg0: i32) -> (i32, i32) {
    %c0_i32 = arith.constant 0 : i32
    %c0_i32_0 = arith.constant 0 : i32
    %c0_i32_1 = arith.constant 0 : i32
    return %c0_i32, %c0_i32_0 : i32, i32
  }
  func.func @transform_3(%arg0: i32) -> (i32, i32) {
    %c0_i32 = arith.constant 0 : i32
    %c0_i32_0 = arith.constant 0 : i32
    %c0_i32_1 = arith.constant 0 : i32
    return %c0_i32, %c0_i32_0 : i32, i32
  }
  func.func @transform_4(%arg0: i32) -> (i32, i32) {
    %c0_i32 = arith.constant 0 : i32
    %c0_i32_0 = arith.constant 0 : i32
    %c0_i32_1 = arith.constant 0 : i32
    return %c0_i32, %c0_i32_0 : i32, i32
  }
  func.func @transform_5(%arg0: i32) -> (i32, i32) {
    %c0_i32 = arith.constant 0 : i32
    %c0_i32_0 = arith.constant 0 : i32
    %c0_i32_1 = arith.constant 0 : i32
    return %c0_i32, %c0_i32_0 : i32, i32
  }
  func.func @transform_6(%arg0: i32) -> (i32, i32) {
    %c0_i32 = arith.constant 0 : i32
    %c0_i32_0 = arith.constant 0 : i32
    %c0_i32_1 = arith.constant 0 : i32
    return %c0_i32, %c0_i32_0 : i32, i32
  }
  func.func @transform_7(%arg0: i32) -> (i32, i32) {
    %c0_i32 = arith.constant 0 : i32
    %c0_i32_0 = arith.constant 0 : i32
    %c0_i32_1 = arith.constant 0 : i32
    return %c0_i32, %c0_i32_0 : i32, i32
  }
  func.func @transform_8(%arg0: i32) -> (i32, i32) {
    %c0_i32 = arith.constant 0 : i32
    %c0_i32_0 = arith.constant 0 : i32
    %c0_i32_1 = arith.constant 0 : i32
    return %c0_i32, %c0_i32_0 : i32, i32
  }
  func.func @transform_9(%arg0: i32) -> (i32, i32) {
    %c0_i32 = arith.constant 0 : i32
    %c0_i32_0 = arith.constant 0 : i32
    %c0_i32_1 = arith.constant 0 : i32
    return %c0_i32, %c0_i32_0 : i32, i32
  }
  func.func @transform_10(%arg0: i32) -> (i32, i32) {
    %c0_i32 = arith.constant 0 : i32
    %c0_i32_0 = arith.constant 0 : i32
    %c0_i32_1 = arith.constant 0 : i32
    return %c0_i32, %c0_i32_0 : i32, i32
  }
  func.func @transform_11(%arg0: i32) -> (i32, i32) {
    %c0_i32 = arith.constant 0 : i32
    %c0_i32_0 = arith.constant 0 : i32
    %c0_i32_1 = arith.constant 0 : i32
    return %c0_i32, %c0_i32_0 : i32, i32
  }
  func.func @transform_12(%arg0: i32) -> (i32, i32) {
    %c0_i32 = arith.constant 0 : i32
    %c0_i32_0 = arith.constant 0 : i32
    %c0_i32_1 = arith.constant 0 : i32
    return %c0_i32, %c0_i32_0 : i32, i32
  }
  func.func @transform_13(%arg0: i32) -> (i32, i32, i32) {
    %c0_i32 = arith.constant 0 : i32
    %c0_i32_0 = arith.constant 0 : i32
    %c0_i32_1 = arith.constant 0 : i32
    return %arg0, %c0_i32, %c0_i32_0 : i32, i32, i32
  }
}

module attributes {stable_mosaic.version = 11 : i64} {
  func.func @_clip_encoder_layer_kernel(%arg0: i32, %arg1: memref<1x8x32xf32, #tpu.memory_space<vmem>>, %arg2: memref<1x32xf32, #tpu.memory_space<vmem>>, %arg3: memref<1x32xf32, #tpu.memory_space<vmem>>, %arg4: memref<32x96xbf16, #tpu.memory_space<vmem>>, %arg5: memref<1x96xf32, #tpu.memory_space<vmem>>, %arg6: memref<32x32xbf16, #tpu.memory_space<vmem>>, %arg7: memref<1x32xf32, #tpu.memory_space<vmem>>, %arg8: memref<1x32xf32, #tpu.memory_space<vmem>>, %arg9: memref<1x32xf32, #tpu.memory_space<vmem>>, %arg10: memref<32x64xbf16, #tpu.memory_space<vmem>>, %arg11: memref<1x64xf32, #tpu.memory_space<vmem>>, %arg12: memref<64x32xbf16, #tpu.memory_space<vmem>>, %arg13: memref<1x32xf32, #tpu.memory_space<vmem>>, %arg14: memref<1x8x32xf32, #tpu.memory_space<vmem>>, %arg15: memref<8x32xbf16, #tpu.memory_space<vmem>>) attributes {dimension_semantics = [#tpu.dimension_semantics<parallel>], iteration_bounds = array<i64: 2>, scalar_prefetch = 0 : i64, scratch_operands = 1 : i64, tpu.core_type = #tpu.core_type<tc>, window_params = [{transform_indices = @transform_0, window_bounds = array<i64: 1, 8, 32>}, {pipeline_mode = #tpu.pipeline_mode<synchronous>, transform_indices = @transform_1, window_bounds = array<i64: 1, 32>}, {pipeline_mode = #tpu.pipeline_mode<synchronous>, transform_indices = @transform_2, window_bounds = array<i64: 1, 32>}, {pipeline_mode = #tpu.pipeline_mode<synchronous>, transform_indices = @transform_3, window_bounds = array<i64: 32, 96>}, {pipeline_mode = #tpu.pipeline_mode<synchronous>, transform_indices = @transform_4, window_bounds = array<i64: 1, 96>}, {pipeline_mode = #tpu.pipeline_mode<synchronous>, transform_indices = @transform_5, window_bounds = array<i64: 32, 32>}, {pipeline_mode = #tpu.pipeline_mode<synchronous>, transform_indices = @transform_6, window_bounds = array<i64: 1, 32>}, {pipeline_mode = #tpu.pipeline_mode<synchronous>, transform_indices = @transform_7, window_bounds = array<i64: 1, 32>}, {pipeline_mode = #tpu.pipeline_mode<synchronous>, transform_indices = @transform_8, window_bounds = array<i64: 1, 32>}, {pipeline_mode = #tpu.pipeline_mode<synchronous>, transform_indices = @transform_9, window_bounds = array<i64: 32, 64>}, {pipeline_mode = #tpu.pipeline_mode<synchronous>, transform_indices = @transform_10, window_bounds = array<i64: 1, 64>}, {pipeline_mode = #tpu.pipeline_mode<synchronous>, transform_indices = @transform_11, window_bounds = array<i64: 64, 32>}, {pipeline_mode = #tpu.pipeline_mode<synchronous>, transform_indices = @transform_12, window_bounds = array<i64: 1, 32>}, {transform_indices = @transform_13, window_bounds = array<i64: 1, 8, 32>}]} {
    %c0 = arith.constant 0 : index
    %c0_0 = arith.constant 0 : index
    %c0_1 = arith.constant 0 : index
    %0 = vector.load %arg1[%c0, %c0_0, %c0_1] : memref<1x8x32xf32, #tpu.memory_space<vmem>>, vector<1x8x32xf32>
    %1 = vector.shape_cast %0 : vector<1x8x32xf32> to vector<8x32xf32>
    %c0_2 = arith.constant 0 : index
    %c0_3 = arith.constant 0 : index
    %2 = vector.load %arg2[%c0_2, %c0_3] : memref<1x32xf32, #tpu.memory_space<vmem>>, vector<1x32xf32>
    %c0_4 = arith.constant 0 : index
    %c0_5 = arith.constant 0 : index
    %3 = vector.load %arg3[%c0_4, %c0_5] : memref<1x32xf32, #tpu.memory_space<vmem>>, vector<1x32xf32>
    %cst = arith.constant dense<0.000000e+00> : vector<8xf32>
    %4 = vector.multi_reduction <add>, %1, %cst [1] : vector<8x32xf32> to vector<8xf32>
    %5 = vector.shape_cast %4 : vector<8xf32> to vector<8x1xf32>
    %cst_6 = arith.constant 3.200000e+01 : f32
    %6 = vector.broadcast %cst_6 : f32 to vector<8x1xf32>
    %7 = arith.divf %5, %6 : vector<8x1xf32>
    %8 = vector.broadcast %7 : vector<8x1xf32> to vector<8x32xf32>
    %9 = arith.subf %1, %8 : vector<8x32xf32>
    %10 = arith.mulf %9, %9 : vector<8x32xf32>
    %cst_7 = arith.constant dense<0.000000e+00> : vector<8xf32>
    %11 = vector.multi_reduction <add>, %10, %cst_7 [1] : vector<8x32xf32> to vector<8xf32>
    %12 = vector.shape_cast %11 : vector<8xf32> to vector<8x1xf32>
    %cst_8 = arith.constant 3.200000e+01 : f32
    %13 = vector.broadcast %cst_8 : f32 to vector<8x1xf32>
    %14 = arith.divf %12, %13 : vector<8x1xf32>
    %cst_9 = arith.constant 9.99999974E-6 : f32
    %15 = vector.broadcast %cst_9 : f32 to vector<8x1xf32>
    %16 = arith.addf %14, %15 : vector<8x1xf32>
    %17 = math.rsqrt %16 : vector<8x1xf32>
    %18 = vector.broadcast %17 : vector<8x1xf32> to vector<8x32xf32>
    %19 = arith.mulf %9, %18 : vector<8x32xf32>
    %20 = vector.broadcast %2 : vector<1x32xf32> to vector<8x32xf32>
    %21 = arith.mulf %19, %20 : vector<8x32xf32>
    %22 = vector.broadcast %3 : vector<1x32xf32> to vector<8x32xf32>
    %23 = arith.addf %21, %22 : vector<8x32xf32>
    %24 = arith.truncf %23 : vector<8x32xf32> to vector<8x32xbf16>
    %c0_10 = arith.constant 0 : index
    %c0_11 = arith.constant 0 : index
    %25 = vector.load %arg4[%c0_10, %c0_11] : memref<32x96xbf16, #tpu.memory_space<vmem>>, vector<32x96xbf16>
    %cst_12 = arith.constant dense<0.000000e+00> : vector<8x96xf32>
    %26 = tpu.matmul %24, %25, %cst_12 {dimension_numbers = #tpu.dot_dimension_numbers<[1], [0], [0], [1], [0, 0, 1, 1], [], []>} : vector<8x32xbf16>, vector<32x96xbf16>, vector<8x96xf32> -> vector<8x96xf32>
    %c0_13 = arith.constant 0 : index
    %c0_14 = arith.constant 0 : index
    %27 = vector.load %arg5[%c0_13, %c0_14] : memref<1x96xf32, #tpu.memory_space<vmem>>, vector<1x96xf32>
    %28 = vector.broadcast %27 : vector<1x96xf32> to vector<8x96xf32>
    %29 = arith.addf %26, %28 : vector<8x96xf32>
    %30 = arith.truncf %29 : vector<8x96xf32> to vector<8x96xbf16>
    %31 = vector.extract_strided_slice %30 {offsets = [0, 0], sizes = [8, 8], strides = [1, 1]} : vector<8x96xbf16> to vector<8x8xbf16>
    %32 = vector.extract_strided_slice %30 {offsets = [0, 32], sizes = [8, 8], strides = [1, 1]} : vector<8x96xbf16> to vector<8x8xbf16>
    %33 = vector.extract_strided_slice %30 {offsets = [0, 64], sizes = [8, 8], strides = [1, 1]} : vector<8x96xbf16> to vector<8x8xbf16>
    %cst_15 = arith.constant dense<0.000000e+00> : vector<8x8xf32>
    %34 = tpu.matmul %31, %32, %cst_15 {dimension_numbers = #tpu.dot_dimension_numbers<[1], [1], [0], [0], [0, 0, 1, 0], [], []>} : vector<8x8xbf16>, vector<8x8xbf16>, vector<8x8xf32> -> vector<8x8xf32>
    %cst_16 = arith.constant dense<0xFF800000> : vector<8xf32>
    %35 = vector.multi_reduction <maximumf>, %34, %cst_16 [1] : vector<8x8xf32> to vector<8xf32>
    %36 = vector.shape_cast %35 : vector<8xf32> to vector<8x1xf32>
    %37 = vector.broadcast %36 : vector<8x1xf32> to vector<8x8xf32>
    %38 = arith.subf %34, %37 : vector<8x8xf32>
    %39 = math.exp %38 : vector<8x8xf32>
    %cst_17 = arith.constant dense<0.000000e+00> : vector<8xf32>
    %40 = vector.multi_reduction <add>, %39, %cst_17 [1] : vector<8x8xf32> to vector<8xf32>
    %41 = vector.shape_cast %40 : vector<8xf32> to vector<8x1xf32>
    %42 = tpu.reciprocal %41 {approx = true} : vector<8x1xf32> -> vector<8x1xf32>
    %43 = vector.broadcast %42 : vector<8x1xf32> to vector<8x8xf32>
    %44 = arith.mulf %39, %43 : vector<8x8xf32>
    %45 = arith.truncf %44 : vector<8x8xf32> to vector<8x8xbf16>
    %cst_18 = arith.constant dense<0.000000e+00> : vector<8x8xf32>
    %46 = tpu.matmul %45, %33, %cst_18 {dimension_numbers = #tpu.dot_dimension_numbers<[1], [0], [0], [1], [0, 0, 1, 1], [], []>} : vector<8x8xbf16>, vector<8x8xbf16>, vector<8x8xf32> -> vector<8x8xf32>
    %47 = arith.truncf %46 : vector<8x8xf32> to vector<8x8xbf16>
    %c0_19 = arith.constant 0 : index
    %c0_20 = arith.constant 0 : index
    %48 = vector.load %arg15[%c0_19, %c0_20] : memref<8x32xbf16, #tpu.memory_space<vmem>>, vector<8x8xbf16>
    tpu.vector_store %arg15[%c0_19, %c0_20], %47 {strides = array<i32>} : memref<8x32xbf16, #tpu.memory_space<vmem>>, vector<8x8xbf16>,
    %49 = vector.extract_strided_slice %30 {offsets = [0, 8], sizes = [8, 8], strides = [1, 1]} : vector<8x96xbf16> to vector<8x8xbf16>
    %50 = vector.extract_strided_slice %30 {offsets = [0, 40], sizes = [8, 8], strides = [1, 1]} : vector<8x96xbf16> to vector<8x8xbf16>
    %51 = vector.extract_strided_slice %30 {offsets = [0, 72], sizes = [8, 8], strides = [1, 1]} : vector<8x96xbf16> to vector<8x8xbf16>
    %cst_21 = arith.constant dense<0.000000e+00> : vector<8x8xf32>
    %52 = tpu.matmul %49, %50, %cst_21 {dimension_numbers = #tpu.dot_dimension_numbers<[1], [1], [0], [0], [0, 0, 1, 0], [], []>} : vector<8x8xbf16>, vector<8x8xbf16>, vector<8x8xf32> -> vector<8x8xf32>
    %cst_22 = arith.constant dense<0xFF800000> : vector<8xf32>
    %53 = vector.multi_reduction <maximumf>, %52, %cst_22 [1] : vector<8x8xf32> to vector<8xf32>
    %54 = vector.shape_cast %53 : vector<8xf32> to vector<8x1xf32>
    %55 = vector.broadcast %54 : vector<8x1xf32> to vector<8x8xf32>
    %56 = arith.subf %52, %55 : vector<8x8xf32>
    %57 = math.exp %56 : vector<8x8xf32>
    %cst_23 = arith.constant dense<0.000000e+00> : vector<8xf32>
    %58 = vector.multi_reduction <add>, %57, %cst_23 [1] : vector<8x8xf32> to vector<8xf32>
    %59 = vector.shape_cast %58 : vector<8xf32> to vector<8x1xf32>
    %60 = tpu.reciprocal %59 {approx = true} : vector<8x1xf32> -> vector<8x1xf32>
    %61 = vector.broadcast %60 : vector<8x1xf32> to vector<8x8xf32>
    %62 = arith.mulf %57, %61 : vector<8x8xf32>
    %63 = arith.truncf %62 : vector<8x8xf32> to vector<8x8xbf16>
    %cst_24 = arith.constant dense<0.000000e+00> : vector<8x8xf32>
    %64 = tpu.matmul %63, %51, %cst_24 {dimension_numbers = #tpu.dot_dimension_numbers<[1], [0], [0], [1], [0, 0, 1, 1], [], []>} : vector<8x8xbf16>, vector<8x8xbf16>, vector<8x8xf32> -> vector<8x8xf32>
    %65 = arith.truncf %64 : vector<8x8xf32> to vector<8x8xbf16>
    %c0_25 = arith.constant 0 : index
    %c8 = arith.constant 8 : index
    %66 = vector.load %arg15[%c0_25, %c8] : memref<8x32xbf16, #tpu.memory_space<vmem>>, vector<8x8xbf16>
    tpu.vector_store %arg15[%c0_25, %c8], %65 {strides = array<i32>} : memref<8x32xbf16, #tpu.memory_space<vmem>>, vector<8x8xbf16>,
    %67 = vector.extract_strided_slice %30 {offsets = [0, 16], sizes = [8, 8], strides = [1, 1]} : vector<8x96xbf16> to vector<8x8xbf16>
    %68 = vector.extract_strided_slice %30 {offsets = [0, 48], sizes = [8, 8], strides = [1, 1]} : vector<8x96xbf16> to vector<8x8xbf16>
    %69 = vector.extract_strided_slice %30 {offsets = [0, 80], sizes = [8, 8], strides = [1, 1]} : vector<8x96xbf16> to vector<8x8xbf16>
    %cst_26 = arith.constant dense<0.000000e+00> : vector<8x8xf32>
    %70 = tpu.matmul %67, %68, %cst_26 {dimension_numbers = #tpu.dot_dimension_numbers<[1], [1], [0], [0], [0, 0, 1, 0], [], []>} : vector<8x8xbf16>, vector<8x8xbf16>, vector<8x8xf32> -> vector<8x8xf32>
    %cst_27 = arith.constant dense<0xFF800000> : vector<8xf32>
    %71 = vector.multi_reduction <maximumf>, %70, %cst_27 [1] : vector<8x8xf32> to vector<8xf32>
    %72 = vector.shape_cast %71 : vector<8xf32> to vector<8x1xf32>
    %73 = vector.broadcast %72 : vector<8x1xf32> to vector<8x8xf32>
    %74 = arith.subf %70, %73 : vector<8x8xf32>
    %75 = math.exp %74 : vector<8x8xf32>
    %cst_28 = arith.constant dense<0.000000e+00> : vector<8xf32>
    %76 = vector.multi_reduction <add>, %75, %cst_28 [1] : vector<8x8xf32> to vector<8xf32>
    %77 = vector.shape_cast %76 : vector<8xf32> to vector<8x1xf32>
    %78 = tpu.reciprocal %77 {approx = true} : vector<8x1xf32> -> vector<8x1xf32>
    %79 = vector.broadcast %78 : vector<8x1xf32> to vector<8x8xf32>
    %80 = arith.mulf %75, %79 : vector<8x8xf32>
    %81 = arith.truncf %80 : vector<8x8xf32> to vector<8x8xbf16>
    %cst_29 = arith.constant dense<0.000000e+00> : vector<8x8xf32>
    %82 = tpu.matmul %81, %69, %cst_29 {dimension_numbers = #tpu.dot_dimension_numbers<[1], [0], [0], [1], [0, 0, 1, 1], [], []>} : vector<8x8xbf16>, vector<8x8xbf16>, vector<8x8xf32> -> vector<8x8xf32>
    %83 = arith.truncf %82 : vector<8x8xf32> to vector<8x8xbf16>
    %c0_30 = arith.constant 0 : index
    %c16 = arith.constant 16 : index
    %84 = vector.load %arg15[%c0_30, %c16] : memref<8x32xbf16, #tpu.memory_space<vmem>>, vector<8x8xbf16>
    tpu.vector_store %arg15[%c0_30, %c16], %83 {strides = array<i32>} : memref<8x32xbf16, #tpu.memory_space<vmem>>, vector<8x8xbf16>,
    %85 = vector.extract_strided_slice %30 {offsets = [0, 24], sizes = [8, 8], strides = [1, 1]} : vector<8x96xbf16> to vector<8x8xbf16>
    %86 = vector.extract_strided_slice %30 {offsets = [0, 56], sizes = [8, 8], strides = [1, 1]} : vector<8x96xbf16> to vector<8x8xbf16>
    %87 = vector.extract_strided_slice %30 {offsets = [0, 88], sizes = [8, 8], strides = [1, 1]} : vector<8x96xbf16> to vector<8x8xbf16>
    %cst_31 = arith.constant dense<0.000000e+00> : vector<8x8xf32>
    %88 = tpu.matmul %85, %86, %cst_31 {dimension_numbers = #tpu.dot_dimension_numbers<[1], [1], [0], [0], [0, 0, 1, 0], [], []>} : vector<8x8xbf16>, vector<8x8xbf16>, vector<8x8xf32> -> vector<8x8xf32>
    %cst_32 = arith.constant dense<0xFF800000> : vector<8xf32>
    %89 = vector.multi_reduction <maximumf>, %88, %cst_32 [1] : vector<8x8xf32> to vector<8xf32>
    %90 = vector.shape_cast %89 : vector<8xf32> to vector<8x1xf32>
    %91 = vector.broadcast %90 : vector<8x1xf32> to vector<8x8xf32>
    %92 = arith.subf %88, %91 : vector<8x8xf32>
    %93 = math.exp %92 : vector<8x8xf32>
    %cst_33 = arith.constant dense<0.000000e+00> : vector<8xf32>
    %94 = vector.multi_reduction <add>, %93, %cst_33 [1] : vector<8x8xf32> to vector<8xf32>
    %95 = vector.shape_cast %94 : vector<8xf32> to vector<8x1xf32>
    %96 = tpu.reciprocal %95 {approx = true} : vector<8x1xf32> -> vector<8x1xf32>
    %97 = vector.broadcast %96 : vector<8x1xf32> to vector<8x8xf32>
    %98 = arith.mulf %93, %97 : vector<8x8xf32>
    %99 = arith.truncf %98 : vector<8x8xf32> to vector<8x8xbf16>
    %cst_34 = arith.constant dense<0.000000e+00> : vector<8x8xf32>
    %100 = tpu.matmul %99, %87, %cst_34 {dimension_numbers = #tpu.dot_dimension_numbers<[1], [0], [0], [1], [0, 0, 1, 1], [], []>} : vector<8x8xbf16>, vector<8x8xbf16>, vector<8x8xf32> -> vector<8x8xf32>
    %101 = arith.truncf %100 : vector<8x8xf32> to vector<8x8xbf16>
    %c0_35 = arith.constant 0 : index
    %c24 = arith.constant 24 : index
    %102 = vector.load %arg15[%c0_35, %c24] : memref<8x32xbf16, #tpu.memory_space<vmem>>, vector<8x8xbf16>
    tpu.vector_store %arg15[%c0_35, %c24], %101 {strides = array<i32>} : memref<8x32xbf16, #tpu.memory_space<vmem>>, vector<8x8xbf16>,
    %c0_36 = arith.constant 0 : index
    %c0_37 = arith.constant 0 : index
    %103 = vector.load %arg15[%c0_36, %c0_37] : memref<8x32xbf16, #tpu.memory_space<vmem>>, vector<8x32xbf16>
    %c0_38 = arith.constant 0 : index
    %c0_39 = arith.constant 0 : index
    %104 = vector.load %arg6[%c0_38, %c0_39] : memref<32x32xbf16, #tpu.memory_space<vmem>>, vector<32x32xbf16>
    %cst_40 = arith.constant dense<0.000000e+00> : vector<8x32xf32>
    %105 = tpu.matmul %103, %104, %cst_40 {dimension_numbers = #tpu.dot_dimension_numbers<[1], [0], [0], [1], [0, 0, 1, 1], [], []>} : vector<8x32xbf16>, vector<32x32xbf16>, vector<8x32xf32> -> vector<8x32xf32>
    %c0_41 = arith.constant 0 : index
    %c0_42 = arith.constant 0 : index
    %106 = vector.load %arg7[%c0_41, %c0_42] : memref<1x32xf32, #tpu.memory_space<vmem>>, vector<1x32xf32>
    %107 = vector.broadcast %106 : vector<1x32xf32> to vector<8x32xf32>
    %108 = arith.addf %105, %107 : vector<8x32xf32>
    %109 = arith.addf %1, %108 : vector<8x32xf32>
    %c0_43 = arith.constant 0 : index
    %c0_44 = arith.constant 0 : index
    %110 = vector.load %arg8[%c0_43, %c0_44] : memref<1x32xf32, #tpu.memory_space<vmem>>, vector<1x32xf32>
    %c0_45 = arith.constant 0 : index
    %c0_46 = arith.constant 0 : index
    %111 = vector.load %arg9[%c0_45, %c0_46] : memref<1x32xf32, #tpu.memory_space<vmem>>, vector<1x32xf32>
    %cst_47 = arith.constant dense<0.000000e+00> : vector<8xf32>
    %112 = vector.multi_reduction <add>, %109, %cst_47 [1] : vector<8x32xf32> to vector<8xf32>
    %113 = vector.shape_cast %112 : vector<8xf32> to vector<8x1xf32>
    %cst_48 = arith.constant 3.200000e+01 : f32
    %114 = vector.broadcast %cst_48 : f32 to vector<8x1xf32>
    %115 = arith.divf %113, %114 : vector<8x1xf32>
    %116 = vector.broadcast %115 : vector<8x1xf32> to vector<8x32xf32>
    %117 = arith.subf %109, %116 : vector<8x32xf32>
    %118 = arith.mulf %117, %117 : vector<8x32xf32>
    %cst_49 = arith.constant dense<0.000000e+00> : vector<8xf32>
    %119 = vector.multi_reduction <add>, %118, %cst_49 [1] : vector<8x32xf32> to vector<8xf32>
    %120 = vector.shape_cast %119 : vector<8xf32> to vector<8x1xf32>
    %cst_50 = arith.constant 3.200000e+01 : f32
    %121 = vector.broadcast %cst_50 : f32 to vector<8x1xf32>
    %122 = arith.divf %120, %121 : vector<8x1xf32>
    %cst_51 = arith.constant 9.99999974E-6 : f32
    %123 = vector.broadcast %cst_51 : f32 to vector<8x1xf32>
    %124 = arith.addf %122, %123 : vector<8x1xf32>
    %125 = math.rsqrt %124 : vector<8x1xf32>
    %126 = vector.broadcast %125 : vector<8x1xf32> to vector<8x32xf32>
    %127 = arith.mulf %117, %126 : vector<8x32xf32>
    %128 = vector.broadcast %110 : vector<1x32xf32> to vector<8x32xf32>
    %129 = arith.mulf %127, %128 : vector<8x32xf32>
    %130 = vector.broadcast %111 : vector<1x32xf32> to vector<8x32xf32>
    %131 = arith.addf %129, %130 : vector<8x32xf32>
    %132 = arith.truncf %131 : vector<8x32xf32> to vector<8x32xbf16>
    %c0_52 = arith.constant 0 : index
    %c0_53 = arith.constant 0 : index
    %133 = vector.load %arg10[%c0_52, %c0_53] : memref<32x64xbf16, #tpu.memory_space<vmem>>, vector<32x64xbf16>
    %cst_54 = arith.constant dense<0.000000e+00> : vector<8x64xf32>
    %134 = tpu.matmul %132, %133, %cst_54 {dimension_numbers = #tpu.dot_dimension_numbers<[1], [0], [0], [1], [0, 0, 1, 1], [], []>} : vector<8x32xbf16>, vector<32x64xbf16>, vector<8x64xf32> -> vector<8x64xf32>
    %c0_55 = arith.constant 0 : index
    %c0_56 = arith.constant 0 : index
    %135 = vector.load %arg11[%c0_55, %c0_56] : memref<1x64xf32, #tpu.memory_space<vmem>>, vector<1x64xf32>
    %136 = vector.broadcast %135 : vector<1x64xf32> to vector<8x64xf32>
    %137 = arith.addf %134, %136 : vector<8x64xf32>
    %cst_57 = arith.constant 1.702000e+00 : f32
    %138 = vector.broadcast %cst_57 : f32 to vector<8x64xf32>
    %139 = arith.mulf %138, %137 : vector<8x64xf32>
    %140 = math.absf %139 : vector<8x64xf32>
    %cst_58 = arith.constant 0.000000e+00 : f32
    %141 = vector.broadcast %cst_58 : f32 to vector<8x64xf32>
    %142 = arith.subf %141, %140 : vector<8x64xf32>
    %143 = math.exp %142 : vector<8x64xf32>
    %cst_59 = arith.constant 1.000000e+00 : f32
    %144 = vector.broadcast %cst_59 : f32 to vector<8x64xf32>
    %145 = arith.addf %144, %143 : vector<8x64xf32>
    %146 = tpu.reciprocal %145 {approx = true} : vector<8x64xf32> -> vector<8x64xf32>
    %cst_60 = arith.constant 0.000000e+00 : f32
    %147 = vector.broadcast %cst_60 : f32 to vector<8x64xf32>
    %148 = arith.cmpf oge, %139, %147 : vector<8x64xf32>
    %149 = arith.mulf %143, %146 : vector<8x64xf32>
    %150 = arith.select %148, %146, %149 : vector<8x64xi1>, vector<8x64xf32>
    %151 = arith.mulf %137, %150 : vector<8x64xf32>
    %152 = arith.truncf %151 : vector<8x64xf32> to vector<8x64xbf16>
    %c0_61 = arith.constant 0 : index
    %c0_62 = arith.constant 0 : index
    %153 = vector.load %arg12[%c0_61, %c0_62] : memref<64x32xbf16, #tpu.memory_space<vmem>>, vector<64x32xbf16>
    %cst_63 = arith.constant dense<0.000000e+00> : vector<8x32xf32>
    %154 = tpu.matmul %152, %153, %cst_63 {dimension_numbers = #tpu.dot_dimension_numbers<[1], [0], [0], [1], [0, 0, 1, 1], [], []>} : vector<8x64xbf16>, vector<64x32xbf16>, vector<8x32xf32> -> vector<8x32xf32>
    %c0_64 = arith.constant 0 : index
    %c0_65 = arith.constant 0 : index
    %155 = vector.load %arg13[%c0_64, %c0_65] : memref<1x32xf32, #tpu.memory_space<vmem>>, vector<1x32xf32>
    %156 = vector.broadcast %155 : vector<1x32xf32> to vector<8x32xf32>
    %157 = arith.addf %154, %156 : vector<8x32xf32>
    %158 = arith.addf %109, %157 : vector<8x32xf32>
    %c0_66 = arith.constant 0 : index
    %c0_67 = arith.constant 0 : index
    %c0_68 = arith.constant 0 : index
    %159 = vector.load %arg14[%c0_66, %c0_67, %c0_68] : memref<1x8x32xf32, #tpu.memory_space<vmem>>, vector<1x8x32xf32>
    %160 = vector.shape_cast %159 : vector<1x8x32xf32> to vector<8x32xf32>
    %161 = vector.shape_cast %158 : vector<8x32xf32> to vector<1x8x32xf32>
    tpu.vector_store %arg14[%c0_66, %c0_67, %c0_68], %161 {strides = array<i32>} : memref<1x8x32xf32, #tpu.memory_space<vmem>>, vector<1x8x32xf32>,
    return
  }
  func.func @transform_0(%arg0: i32) -> (i32, i32, i32) {
    %c0_i32 = arith.constant 0 : i32
    %c0_i32_0 = arith.constant 0 : i32
    %c0_i32_1 = arith.constant 0 : i32
    return %arg0, %c0_i32, %c0_i32_0 : i32, i32, i32
  }
  func.func @transform_1(%arg0: i32) -> (i32, i32) {
    %c0_i32 = arith.constant 0 : i32
    %c0_i32_0 = arith.constant 0 : i32
    %c0_i32_1 = arith.constant 0 : i32
    return %c0_i32, %c0_i32_0 : i32, i32
  }
  func.func @transform_2(%arg0: i32) -> (i32, i32) {
    %c0_i32 = arith.constant 0 : i32
    %c0_i32_0 = arith.constant 0 : i32
    %c0_i32_1 = arith.constant 0 : i32
    return %c0_i32, %c0_i32_0 : i32, i32
  }
  func.func @transform_3(%arg0: i32) -> (i32, i32) {
    %c0_i32 = arith.constant 0 : i32
    %c0_i32_0 = arith.constant 0 : i32
    %c0_i32_1 = arith.constant 0 : i32
    return %c0_i32, %c0_i32_0 : i32, i32
  }
  func.func @transform_4(%arg0: i32) -> (i32, i32) {
    %c0_i32 = arith.constant 0 : i32
    %c0_i32_0 = arith.constant 0 : i32
    %c0_i32_1 = arith.constant 0 : i32
    return %c0_i32, %c0_i32_0 : i32, i32
  }
  func.func @transform_5(%arg0: i32) -> (i32, i32) {
    %c0_i32 = arith.constant 0 : i32
    %c0_i32_0 = arith.constant 0 : i32
    %c0_i32_1 = arith.constant 0 : i32
    return %c0_i32, %c0_i32_0 : i32, i32
  }
  func.func @transform_6(%arg0: i32) -> (i32, i32) {
    %c0_i32 = arith.constant 0 : i32
    %c0_i32_0 = arith.constant 0 : i32
    %c0_i32_1 = arith.constant 0 : i32
    return %c0_i32, %c0_i32_0 : i32, i32
  }
  func.func @transform_7(%arg0: i32) -> (i32, i32) {
    %c0_i32 = arith.constant 0 : i32
    %c0_i32_0 = arith.constant 0 : i32
    %c0_i32_1 = arith.constant 0 : i32
    return %c0_i32, %c0_i32_0 : i32, i32
  }
  func.func @transform_8(%arg0: i32) -> (i32, i32) {
    %c0_i32 = arith.constant 0 : i32
    %c0_i32_0 = arith.constant 0 : i32
    %c0_i32_1 = arith.constant 0 : i32
    return %c0_i32, %c0_i32_0 : i32, i32
  }
  func.func @transform_9(%arg0: i32) -> (i32, i32) {
    %c0_i32 = arith.constant 0 : i32
    %c0_i32_0 = arith.constant 0 : i32
    %c0_i32_1 = arith.constant 0 : i32
    return %c0_i32, %c0_i32_0 : i32, i32
  }
  func.func @transform_10(%arg0: i32) -> (i32, i32) {
    %c0_i32 = arith.constant 0 : i32
    %c0_i32_0 = arith.constant 0 : i32
    %c0_i32_1 = arith.constant 0 : i32
    return %c0_i32, %c0_i32_0 : i32, i32
  }
  func.func @transform_11(%arg0: i32) -> (i32, i32) {
    %c0_i32 = arith.constant 0 : i32
    %c0_i32_0 = arith.constant 0 : i32
    %c0_i32_1 = arith.constant 0 : i32
    return %c0_i32, %c0_i32_0 : i32, i32
  }
  func.func @transform_12(%arg0: i32) -> (i32, i32) {
    %c0_i32 = arith.constant 0 : i32
    %c0_i32_0 = arith.constant 0 : i32
    %c0_i32_1 = arith.constant 0 : i32
    return %c0_i32, %c0_i32_0 : i32, i32
  }
  func.func @transform_13(%arg0: i32) -> (i32, i32, i32) {
    %c0_i32 = arith.constant 0 : i32
    %c0_i32_0 = arith.constant 0 : i32
    %c0_i32_1 = arith.constant 0 : i32
    return %arg0, %c0_i32, %c0_i32_0 : i32, i32, i32
  }
}

</mosaic_0001>

<bundles_post_ra>
// kernel: clip_encoder.3
= control target key start
LH: loop header
LB: loop body
LE: loop exit
PB: predicated region body
PF: predicated region fallthrough
CT: control target
= control target key end

     0   :  { %s1994_s0 = inlined_call_operand.vmem [shape: f32[2,8,32], index: 0, kind: input, shape index: {}]   ;;  %s1995_s1 = inlined_call_operand.vmem [shape: f32[1,32], index: 1, kind: input, shape index: {}]   ;;  %s1996_s2 = inlined_call_operand.vmem [shape: f32[1,32], index: 2, kind: input, shape index: {}]   ;;  %s1997_s3 = inlined_call_operand.vmem [shape: bf16[32,96], index: 3, kind: input, shape index: {}]   ;;  %s1998_s4 = inlined_call_operand.vmem [shape: f32[1,96], index: 4, kind: input, shape index: {}]   ;;  %s1999_s5 = inlined_call_operand.vmem [shape: bf16[32,32], index: 5, kind: input, shape index: {}]   ;;  %s2000_s6 = inlined_call_operand.vmem [shape: f32[1,32], index: 6, kind: input, shape index: {}]   ;;  %s2001_s7 = inlined_call_operand.vmem [shape: f32[1,32], index: 7, kind: input, shape index: {}]   ;;  %s2002_s8 = inlined_call_operand.vmem [shape: f32[1,32], index: 8, kind: input, shape index: {}]   ;;  %s2003_s9 = inlined_call_operand.vmem [shape: bf16[32,64], index: 9, kind: input, shape index: {}]   ;;  %s2004_s10 = inlined_call_operand.vmem [shape: f32[1,64], index: 10, kind: input, shape index: {}]   ;;  %s2005_s11 = inlined_call_operand.vmem [shape: bf16[64,32], index: 11, kind: input, shape index: {}]   ;;  %s2006_s12 = inlined_call_operand.vmem [shape: f32[1,32], index: 12, kind: input, shape index: {}]   ;;  %s2007_s13 = inlined_call_operand.hbm [shape: f32[2,8,32], index: 13, kind: output, shape index: {}]  }
   0x1   :  { %2008 = sst [smem:[#allocation6_spill]] %s1994_s0 }
   0x2   :  { %2009 = sst [smem:[#allocation7_spill]] %s1995_s1 }
   0x3   :  { %2010 = sst [smem:[#allocation8_spill]] %s1996_s2 }
   0x4   :  { %18 = vsyncpa [#allocation4], 0 }
   0x5   :  { %20 = vsyncpa [#allocation4 + $0x1], 0  ;;  %s1742_s25 = smov 0   ;;  %s1744_s26 = smov 0  }
   0x6   :  { %s1746_s27 = smov 0   ;;  %s1748_s28 = smov 0  }
   0x7 LB: > { %s1763_s29 = sadd.s32 4294967295, %s1653_s28   ;;  %s1342_s30 = sadd.s32 4294967294, %s1653_s28   ;;  %s1653_s28 = sphi %s1748_s28, %s2019_s28   ;;  %s1649_s27 = sphi %s1746_s27, %s2018_s27   ;;  %s1645_s26 = sphi %s1744_s26, %s2017_s26   ;;  %s1641_s25 = sphi %s1742_s25, %s2016_s25  }
   0x8   : > { %s1767_s14 = sadd.s32 1, %s1653_s28   ;;  %s311_s15 = sadd.s32 1, %s1649_s27 }
   0x9   : > { %s308_s16 = ssub.s32 %s1653_s28, %s1767_s14  ;;  %p321_p0 = scmp.ne.s32.totalorder %s1649_s27, %s1645_s26 }
   0xa   : > { %p309_p1 = scmp.eq.s32.totalorder %s308_s16, 0  ;;  %p322_p2 = scmp.eq.s32.totalorder %s1763_s29, 1 }
   0xb   : > { %p327_p3 = scmp.ne.s32.totalorder %s1645_s26, %s1641_s25  ;;  %p328_p4 = scmp.eq.s32.totalorder %s1342_s30, 1 }
   0xc   : > { %s1778_s17 = scalar_select %p309_p1, %s1649_s27, %s311_s15  }
   0xd   : > { %p1780_p5 = por %p322_p2, %p321_p0  ;;  %p1784_p6 = por %p328_p4, %p327_p3 }
   0xe   : > { %p1345_p7 = scmp.ge.s32.totalorder %s1653_s28, 1  ;;  %p389_p8 = scmp.lt.s32.totalorder %s1653_s28, 3 }
  0x10   : > { %p390_p9 = pnand %p1345_p7, %p389_p8 }
  0x11   : > { %p432_p10 = scmp.lt.s32.totalorder (!%p390_p9), %s1763_s29, 1  ;;  %vm440_vm0 = vcmask (!%p390_p9), 261120   ;;  %s2013_s0 = sld [smem:[#allocation6_spill]] (!%p390_p9)  ;;  %v1557_v7 = vld [vmem:[%s1997_s3] sm:$0xff] (!%p390_p9)   ;;  %v1655_v8 = vmov (!%p390_p9), 0.0   ;;  %vm1656_vm1 = vmmov (!%p390_p9), 0  }
  0x12   : > { %393 = sbr.rel (%p390_p9) target bundleno = 2624 (0xa40), region = 72  ;;  %1418 = vmatprep.subr.bf16.mxu0 (!%p390_p9), %v1655_v8  ;;  %1422 = vmatprep.mubr.msk.bf16.mxu0 (!%p390_p9), %vm1656_vm1, %v1655_v8  ;;  %v1558_v9 = vld [vmem:[%s1997_s3 + $0x8] sm:$0xff] (!%p390_p9)   ;;  %s2014_s1 = sld [smem:[#allocation7_spill]] (!%p390_p9)  ;;  %v1350_v20 = vld [vmem:[%s1998_s4] ss:$0 sm:$0xff] (!%p390_p9)  ;;  %vm540_vm2 = vcmask (!%p390_p9), 64512  }
  0x13   : > { %1419 = vmatpush3.bf16.msra.mxu0 (!%p390_p9), %v1557_v7  ;;  %1426 = vmatprep.subr.bf16.mxu1 (!%p390_p9), %v1655_v8  ;;  %s2015_s2 = sld [smem:[#allocation8_spill]] (!%p390_p9)  ;;  %s1657_s16 = smov (!%p390_p9), 120   ;;  %vm604_vm3 = vcmask (!%p390_p9), 1043456   ;;  %vm649_vm4 = vcmask (!%p390_p9), 60416   ;;  %vm768_vm5 = vcmask (!%p390_p9), 126016   ;;  %vm887_vm6 = vcmask (!%p390_p9), 191616  }
  0x14   : > { %1420 = vmatprep.subr.bf16.mxu0 (!%p390_p9), %v1655_v8  ;;  %1428 = vmatprep.mubr.msk.bf16.mxu1 (!%p390_p9), %vm1656_vm1, %v1655_v8  ;;  %s1660_s22 = smov (!%p390_p9), 80   ;;  %s1661_s23 = smov (!%p390_p9), 112   ;;  %vm1006_vm7 = vcmask (!%p390_p9), 257216   ;;  %vm1223_vm9 = vcmask (!%p390_p9), 523264  }
  0x15   : > { %s1663_s30 = smov (!%p390_p9), 104   ;;  %s1664_s15 = smov (!%p390_p9), 64  }
  0x17   : > { %1421 = vmatpush3.bf16.msra.mxu0 (!%p390_p9), %v1558_v9 }
  0x18   : > { %1432 = vmatprep.subr.bf16.mxu0 (!%p390_p9), %v1655_v8  ;;  %v1348_v14 = vld [vmem:[%s2014_s1] ss:$0 sm:$0xff] (!%p390_p9) }
  0x19   : > { %s433_s20 = scalar_select %p432_p10, %s1763_s29, 1  ;;  %v1349_v16 = vld [vmem:[%s2015_s2] ss:$0 sm:$0xff] }
  0x1b   : > { %s1347_s21 = sshll.u32 %s433_s20, 3  ;;  %s1658_s20 = smov 96  }
  0x1c   : > { %s435_s24 = scalar_lea.vmem %s2013_s0, %s1347_s21  ;;  %s1659_s21 = smov 88  }
  0x1d   : > { %v1795_v0 = vld [vmem:[%s435_s24] sm:$0xff]  ;;  %s1662_s24 = smov 72  }
  0x1e   : > { %v441_v1 = vsel %vm440_vm0, %v1795_v0, 0.0 }
  0x1f   : > { %442 = vadd.xlane.f32.xlu0 %v441_v1 }
  0xac   : > { %v443_v2 = vpop.xlane.xlu0 %442 }
  0xad   : > { %v445_v3 = vmul.f32 0.03125, %v443_v2 }
  0xaf   : > { %v446_v4 = vsub.f32 %v1795_v0, %v445_v3 }
  0xb1   : > { %v447_v5 = vmul.f32 %v446_v4, %v446_v4 }
  0xb3   : > { %v448_v6 = vsel %vm440_vm0, %v447_v5, 0.0 }
  0xb4   : > { %449 = vadd.xlane.f32.xlu0 %v448_v6 }
 0x141   : > { %v450_v10 = vpop.xlane.xlu0 %449 }
 0x142   : > { %v451_v11 = vmul.f32 0.03125, %v450_v10 }
 0x144   : > { %v452_v12 = vadd.f32 1e-05, %v451_v11 }
 0x146   : > { %1567 = vrsqrt.f32 %v452_v12 }
 0x150   : > { %v1568_v13 = vpop.eup %1567 }
 0x151   : > { %v454_v15 = vmul.f32 %v1568_v13, %v446_v4 }
 0x153   : > { %v461_v17 = vmul.f32 %v1348_v14, %v454_v15 }
 0x155   : > { %v468_v18 = vadd.f32 %v1349_v16, %v461_v17 }
 0x157   : > { %v469_v19 = vpack.c.bf16 %v468_v18, %v468_v18 }
 0x159   : > { %1423 = vmatmul.mubr.msk.bf16.vlgmr.msra.gmra.mrb[0].mxu0 %vm440_vm0, %v469_v19 }
 0x15a   : > { %1434 = vmatprep.mubr.msk.bf16.mxu0 %vm1656_vm1, %v1655_v8 }
 0x22c   : > { %v530_v21 = vpop.f32.mrb[0].mxu0 }
 0x22d   : > { %v531_v22 = vadd.f32 %v1350_v20, %v530_v21  ;;  %v1424_v23 = vpop.f32.mrb[1].mxu0 }
 0x22e   : > { %v533_v24 = vpop.f32.mrb[2].mxu0 }
 0x22f   : > { %v1827_v25 = vpack.c.bf16 %v531_v22, %v531_v22  ;;  %v1425_v26 = vpop.f32.mrb[3].mxu0 }
 0x231   : > { %651 = vrot.lane.b32.xlu0 %v1827_v25, %s1657_s16  ;;  %538 = vrot.lane.b32.xlu1 %v1827_v25, %s1658_s20  ;;  %s1665_s16 = smov 56   ;;  %s1666_s20 = smov 48  }
 0x235   : > { %653 = vrot.lane.b32.xlu1 %v1827_v25, %s1659_s21  ;;  %s1667_s21 = smov 40  }
 0x239   : > { %772 = vrot.lane.b32.xlu1 %v1827_v25, %s1660_s22  ;;  %s1668_s22 = smov 8  }
 0x23d   : > { %770 = vrot.lane.b32.xlu1 %v1827_v25, %s1661_s23 }
 0x241   : > { %891 = vrot.lane.b32.xlu1 %v1827_v25, %s1662_s24 }
 0x245   : > { %889 = vrot.lane.b32.xlu1 %v1827_v25, %s1663_s30  ;;  %s429_s30 = sand.u32 1, %s1645_s26  }
 0x2a3   : > { %v539_v27 = vpop.permute.xlu1 %538  ;;  %v652_v32 = vpop.permute.xlu0 %651 }
 0x2a4   : > { %v545_v28 = vsel %vm540_vm2, %v539_v27, 0 }
 0x2a5   : > { %1427 = vmatpush3.bf16.xpose.msra.mxu1 %v545_v28 }
 0x2a6   : > { %1438 = vmatprep.subr.bf16.mxu1 %v1655_v8 }
 0x2a7   : > { %v654_v29 = vpop.permute.xlu1 %653 }
 0x2a8   : > { %v659_v30 = vsel %vm540_vm2, %v654_v29, 0 }
 0x2ab   : > { %v773_v31 = vpop.permute.xlu1 %772 }
 0x2ac   : > { %1429 = vmatmul.mubr.msk.bf16.vlgmr.msra.gmra.mrb[0].mxu1 %vm540_vm2, %v1827_v25  ;;  %v778_v34 = vsel %vm540_vm2, %v773_v31, 0 }
 0x2ad   : > { %1439 = vmatpush3.bf16.xpose.msra.mxu1 %v659_v30  ;;  %1440 = vmatprep.mubr.msk.bf16.mxu1 %vm1656_vm1, %v1655_v8 }
 0x2ae   : > { %1450 = vmatprep.subr.bf16.mxu1 %v1655_v8 }
 0x2af   : > { %v771_v33 = vpop.permute.xlu1 %770 }
 0x2b3   : > { %v892_v35 = vpop.permute.xlu1 %891 }
 0x2b4   : > { %1441 = vmatmul.mubr.msk.bf16.vlgmr.msra.gmra.mrb[4].mxu1 %vm540_vm2, %v652_v32  ;;  %v897_v36 = vsel %vm540_vm2, %v892_v35, 0 }
 0x2b5   : > { %1451 = vmatpush3.bf16.xpose.msra.mxu1 %v778_v34  ;;  %1452 = vmatprep.mubr.msk.bf16.mxu1 %vm1656_vm1, %v1655_v8 }
 0x2b6   : > { %1462 = vmatprep.subr.bf16.mxu1 %v1655_v8 }
 0x2b7   : > { %v890_v37 = vpop.permute.xlu1 %889 }
 0x2bc   : > { %1453 = vmatmul.mubr.msk.bf16.vlgmr.msra.gmra.mrb[8].mxu1 %vm540_vm2, %v771_v33 }
 0x2bd   : > { %1463 = vmatpush3.bf16.xpose.msra.mxu1 %v897_v36  ;;  %1464 = vmatprep.mubr.msk.bf16.mxu1 %vm1656_vm1, %v1655_v8 }
 0x2be   : > { %1474 = vmatprep.subr.bf16.mxu1 %v1655_v8 }
 0x2c4   : > { %1465 = vmatmul.mubr.msk.bf16.vlgmr.msra.gmra.mrb[12].mxu1 %vm540_vm2, %v890_v37 }
 0x2c5   : > { %1478 = vmatprep.mubr.msk.bf16.mxu1 %vm1656_vm1, %v1655_v8 }
 0x37f   : > { %v581_v38 = vpop.f32.mrb[0].mxu1 }
 0x380   : > { %v1430_v39 = vpop.f32.mrb[1].mxu1  ;;  %v587_v40 = vsel %vm540_vm2, %v581_v38, -inf }
 0x381   : > { %588 = vmax.xlane.f32.xlu1 %v587_v40  ;;  %v584_v41 = vpop.f32.mrb[2].mxu1 }
 0x382   : > { %v1431_v42 = vpop.f32.mrb[3].mxu1 }
 0x387   : > { %v695_v43 = vpop.f32.mrb[4].mxu1 }
 0x388   : > { %v1442_v44 = vpop.f32.mrb[5].mxu1  ;;  %v701_v45 = vsel %vm540_vm2, %v695_v43, -inf }
 0x389   : > { %702 = vmax.xlane.f32.xlu0 %v701_v45  ;;  %v698_v46 = vpop.f32.mrb[6].mxu1 }
 0x38a   : > { %v1443_v47 = vpop.f32.mrb[7].mxu1 }
 0x38f   : > { %v814_v48 = vpop.f32.mrb[8].mxu1 }
 0x390   : > { %v1454_v49 = vpop.f32.mrb[9].mxu1  ;;  %v820_v50 = vsel %vm540_vm2, %v814_v48, -inf }
 0x391   : > { %821 = vmax.xlane.f32.xlu1 %v820_v50  ;;  %v817_v51 = vpop.f32.mrb[10].mxu1  ;;  %v1559_v50 = vld [vmem:[%s1999_s5] sm:$0xff]  }
 0x392   : > { %v1455_v52 = vpop.f32.mrb[11].mxu1  ;;  %1475 = vmatpush3.bf16.msra.mxu1 %v1559_v50 }
 0x393   : > { %v1560_v52 = vld [vmem:[%s1999_s5 + $0x8] sm:$0xff]   ;;  %1476 = vmatprep.subr.bf16.mxu1 %v1655_v8 }
 0x396   : > { %1477 = vmatpush3.bf16.msra.mxu1 %v1560_v52 }
 0x397   : > { %v933_v53 = vpop.f32.mrb[12].mxu1  ;;  %1490 = vmatprep.subr.bf16.mxu1 %v1655_v8 }
 0x398   : > { %v1466_v54 = vpop.f32.mrb[13].mxu1  ;;  %v939_v55 = vsel %vm540_vm2, %v933_v53, -inf }
 0x399   : > { %940 = vmax.xlane.f32.xlu0 %v939_v55  ;;  %v936_v56 = vpop.f32.mrb[14].mxu1 }
 0x39a   : > { %v1467_v57 = vpop.f32.mrb[15].mxu1 }
 0x40e   : > { %v589_v58 = vpop.xlane.xlu1 %588 }
 0x40f   : > { %v590_v59 = vsub.f32 %v581_v38, %v589_v58 }
 0x411   : > { %v591_v60 = vmul.f32 1.442695, %v590_v59 }
 0x413   : > { %1569 = vpow2.f32 %v591_v60 }
 0x416   : > { %v703_v61 = vpop.xlane.xlu0 %702 }
 0x417   : > { %v704_v62 = vsub.f32 %v695_v43, %v703_v61 }
 0x419   : > { %v705_v63 = vmul.f32 1.442695, %v704_v62 }
 0x41b   : > { %1571 = vpow2.f32 %v705_v63 }
 0x41d   : > { %v1570_v1 = vpop.eup %1569 }
 0x41e   : > { %v593_v2 = vsel %vm540_vm2, %v1570_v1, 0.0  ;;  %v822_v11 = vpop.xlane.xlu1 %821 }
 0x41f   : > { %594 = vadd.xlane.f32.xlu1 %v593_v2  ;;  %v823_v12 = vsub.f32 %v814_v48, %v822_v11 }
 0x421   : > { %v824_v13 = vmul.f32 1.442695, %v823_v12 }
 0x425   : > { %v1572_v3 = vpop.eup %1571 }
 0x426   : > { %v941_v4 = vpop.xlane.xlu0 %940  ;;  %v707_v5 = vsel %vm540_vm2, %v1572_v3, 0.0 }
 0x427   : > { %v942_v6 = vsub.f32 %v933_v53, %v941_v4  ;;  %708 = vadd.xlane.f32.xlu0 %v707_v5 }
 0x429   : > { %v943_v7 = vmul.f32 1.442695, %v942_v6 }
 0x42b   : > { %1573 = vpow2.f32 %v943_v7 }
 0x42c   : > { %1575 = vpow2.f32 %v824_v13 }
 0x430   : > { %599 = vrot.lane.b32.xlu1 %v1827_v25, %s1664_s15  ;;  %s1346_s15 = sshll.u32 %s429_s30, 3 }
 0x435   : > { %v1574_v9 = vpop.eup %1573 }
 0x436   : > { %v945_v10 = vsel %vm540_vm2, %v1574_v9, 0.0  ;;  %v1576_v14 = vpop.eup %1575 }
 0x437   : > { %946 = vadd.xlane.f32.xlu0 %v945_v10  ;;  %v826_v15 = vsel %vm540_vm2, %v1576_v14, 0.0 }
 0x44d   : > { %713 = vrot.lane.b32.xlu0 %v1827_v25, %s1665_s16  ;;  %s1669_s16 = smov 16  }
 0x454   : > { %827 = vadd.xlane.f32.xlu1 %v826_v15 }
 0x465   : > { %832 = vrot.lane.b32.xlu1 %v1827_v25, %s1666_s20  ;;  %s1670_s20 = smov 24  }
 0x469   : > { %951 = vrot.lane.b32.xlu1 %v1827_v25, %s1667_s21  ;;  %s1382_s21 = sshll.u32 %s1763_s29, 7  ;;  %s1270_s29 = scalar_lea.sflag [#allocation4], %s429_s30 }
 0x46a   : > { %s1951_s1 = scalar_lea.hbm %s2007_s13, %s1382_s21 }
 0x4ac   : > { %v595_v16 = vpop.xlane.xlu1 %594 }
 0x4ad   : > { %1577 = vrcp.f32 %v595_v16 }
 0x4b0   : > { %v600_v17 = vpop.permute.xlu1 %599 }
 0x4b1   : > { %v606_v18 = vsel %vm604_vm3, %v600_v17, 0  ;;  %v1561_v17 = vld [vmem:[%s2003_s9] sm:$0xff]  }
 0x4b2   : > { %1433 = vmatpush3.bf16.msra.mxu0 %v606_v18 }
 0x4b3   : > { %1444 = vmatprep.subr.bf16.mxu0 %v1655_v8 }
 0x4b4   : > { %v709_v20 = vpop.xlane.xlu0 %708 }
 0x4b5   : > { %1579 = vrcp.f32 %v709_v20 }
 0x4b7   : > { %v1578_v19 = vpop.eup %1577 }
 0x4b8   : > { %v597_v21 = vmul.f32 %v1578_v19, %v1570_v1 }
 0x4ba   : > { %v598_v22 = vpack.c.bf16 %v597_v21, %v597_v21 }
 0x4bc   : > { %1435 = vmatmul.mubr.msk.bf16.vlgmr.msra.gmra.mrb[4].mxu0 %vm540_vm2, %v598_v22  ;;  %v1369_v22 = vld [vmem:[%s2001_s7] ss:$0 sm:$0xff] }
 0x4bd   : > { %1446 = vmatprep.mubr.msk.bf16.mxu0 %vm1656_vm1, %v1655_v8 }
 0x4bf   : > { %v1580_v23 = vpop.eup %1579 }
 0x4c0   : > { %v711_v25 = vmul.f32 %v1580_v23, %v1572_v3  ;;  %v1365_v3 = vld [vmem:[%s2000_s6] ss:$0 sm:$0xff] }
 0x4c2   : > { %v712_v28 = vpack.c.bf16 %v711_v25, %v711_v25 }
 0x4c4   : > { %v947_v24 = vpop.xlane.xlu0 %946 }
 0x4c8   : > { %v714_v26 = vpop.permute.xlu0 %713 }
 0x4c9   : > { %v719_v27 = vsel %vm604_vm3, %v714_v26, 0 }
 0x4ca   : > { %1445 = vmatpush3.bf16.msra.mxu0 %v719_v27 }
 0x4cb   : > { %1456 = vmatprep.subr.bf16.mxu0 %v1655_v8 }
 0x4cd   : > { %1447 = vmatmul.mubr.msk.bf16.vlgmr.msra.gmra.mrb[8].mxu0 %vm540_vm2, %v712_v28  ;;  %v1563_v28 = vld [vmem:[%s2005_s11] sm:$0xff]  }
 0x4ce   : > { %1458 = vmatprep.mubr.msk.bf16.mxu0 %vm1656_vm1, %v1655_v8 }
 0x4e1   : > { %v828_v29 = vpop.xlane.xlu1 %827 }
 0x4e2   : > { %1581 = vrcp.f32 %v828_v29  ;;  %v1564_v29 = vld [vmem:[%s2005_s11 + $0x8] sm:$0xff]  }
 0x4e3   : > { %1583 = vrcp.f32 %v947_v24  ;;  %v1370_v24 = vld [vmem:[%s2002_s8] ss:$0 sm:$0xff] }
 0x4e5   : > { %v833_v30 = vpop.permute.xlu1 %832 }
 0x4e6   : > { %v838_v31 = vsel %vm604_vm3, %v833_v30, 0  ;;  %v1565_v30 = vld [vmem:[%s2005_s11 + $0x10] sm:$0xff]  }
 0x4e7   : > { %1457 = vmatpush3.bf16.msra.mxu0 %v838_v31  ;;  %v1566_v31 = vld [vmem:[%s2005_s11 + $0x18] sm:$0xff]  }
 0x4e8   : > { %1468 = vmatprep.subr.bf16.mxu0 %v1655_v8 }
 0x4e9   : > { %v952_v34 = vpop.permute.xlu1 %951 }
 0x4ea   : > { %v957_v37 = vsel %vm604_vm3, %v952_v34, 0 }
 0x4ec   : > { %v1582_v32 = vpop.eup %1581 }
 0x4ed   : > { %v830_v33 = vmul.f32 %v1582_v32, %v1576_v14  ;;  %v1584_v36 = vpop.eup %1583  ;;  %v1371_v32 = vld [vmem:[%s2004_s10] ss:$0 sm:$0xff] }
 0x4ee   : > { %v949_v38 = vmul.f32 %v1584_v36, %v1574_v9 }
 0x4ef   : > { %v831_v35 = vpack.c.bf16 %v830_v33, %v830_v33 }
 0x4f0   : > { %v950_v39 = vpack.c.bf16 %v949_v38, %v949_v38 }
 0x4f1   : > { %1459 = vmatmul.mubr.msk.bf16.vlgmr.msra.gmra.mrb[12].mxu0 %vm540_vm2, %v831_v35 }
 0x4f2   : > { %1469 = vmatpush3.bf16.msra.mxu0 %v957_v37  ;;  %1470 = vmatprep.mubr.msk.bf16.mxu0 %vm1656_vm1, %v1655_v8 }
 0x4f3   : > { %1482 = vmatprep.subr.bf16.mxu0 %v1655_v8 }
 0x4f9   : > { %1471 = vmatmul.mubr.msk.bf16.vlgmr.msra.gmra.mrb[16].mxu0 %vm540_vm2, %v950_v39 }
 0x4fa   : > { %1486 = vmatprep.mubr.msk.bf16.mxu0 %vm1656_vm1, %v1655_v8  ;;  %1483 = vmatpush3.bf16.msra.mxu0 %v1561_v17 }
 0x4fb   : > { %1484 = vmatprep.subr.bf16.mxu0 %v1655_v8 }
 0x58f   : > { %v642_v40 = vpop.f32.mrb[4].mxu0 }
 0x590   : > { %v648_v41 = vpack.c.bf16 %v642_v40, %v642_v40  ;;  %v1436_v42 = vpop.f32.mrb[5].mxu0 }
 0x591   : > { %v645_v43 = vpop.f32.mrb[6].mxu0 }
 0x592   : > { %650 = vst.msk [vmem:[#allocation2] sm:$0xf] %vm649_vm4, %v648_v41  ;;  %v1437_v44 = vpop.f32.mrb[7].mxu0 }
 0x5a0   : > { %v755_v45 = vpop.f32.mrb[8].mxu0 }
 0x5a1   : > { %v1385_v46 = vpack.c.bf16 %v755_v45, %v755_v45  ;;  %v1448_v47 = vpop.f32.mrb[9].mxu0 }
 0x5a2   : > { %v758_v48 = vpop.f32.mrb[10].mxu0 }
 0x5a3   : > { %765 = vrot.lane.b32.xlu0 %v1385_v46, %s1668_s22  ;;  %v1449_v49 = vpop.f32.mrb[11].mxu0  ;;  %v1375_v48 = vld [vmem:[%s2006_s12] ss:$0 sm:$0xff]  ;;  %s431_s22 = scalar_lea.vmem [#allocation3], %s1346_s15 }
 0x5a4   : > { %s1283_s23 = sshll.u32 %s431_s22, 4  ;;  %s1953_s23 = int_to_ptr.vmem [resolvable:$true] %s1283_s23 }
 0x5a5   : > { %s1591_s15 = scalar_lea.vmem %s1953_s23, 128 }
 0x5a6   : > { %p1592_p11 = scmp.ne.s32.totalorder %s1953_s23, %s1591_s15 }
 0x5a8   : > { %p1593_p12 = pnand %p1592_p11, %p1780_p5 }
 0x5aa   : > { %p1594_p13 = pneg %p1593_p12 }
 0x5c4   : > { %v874_v51 = vpop.f32.mrb[12].mxu0 }
 0x5c5   : > { %v1386_v53 = vpack.c.bf16 %v874_v51, %v874_v51  ;;  %v1460_v54 = vpop.f32.mrb[13].mxu0 }
 0x5c6   : > { %v877_v55 = vpop.f32.mrb[14].mxu0 }
 0x5c7   : > { %884 = vrot.lane.b32.xlu1 %v1386_v53, %s1669_s16  ;;  %v1461_v56 = vpop.f32.mrb[15].mxu0  ;;  %s1671_s16 = smov [#allocation3]  }
 0x5cc   : > { %v993_v57 = vpop.f32.mrb[16].mxu0 }
 0x5cd   : > { %v1387_v58 = vpack.c.bf16 %v993_v57, %v993_v57  ;;  %v1472_v59 = vpop.f32.mrb[17].mxu0 }
 0x5ce   : > { %v996_v60 = vpop.f32.mrb[18].mxu0 }
 0x5cf   : > { %1003 = vrot.lane.b32.xlu0 %v1387_v58, %s1670_s20  ;;  %v1473_v61 = vpop.f32.mrb[19].mxu0  ;;  %s1595_s20 = sshll.u32 %s1671_s16, 4  ;;  %s1596_s20 = int_to_ptr.vmem [resolvable:$false] %s1595_s20 }
 0x5d0   : > { %s1597_s2 = scalar_lea.vmem %s1596_s20, 256  ;;  %p1598_p0 = scmp.lt.s32.totalorder %s1953_s23, %s1596_s20 }
 0x5d1   : > { %p1599_p1 = scmp.lt.s32.totalorder %s1597_s2, %s1591_s15 }
 0x5d3   : > { %p1600_p2 = por %p1599_p1, %p1598_p0 }
 0x5d5   : > { %p1601_p3 = pnand %p1600_p2, %p1594_p13 }
 0x615   : > { %v766_v62 = vpop.permute.xlu0 %765 }
 0x616   : > { %769 = vst.msk [vmem:[#allocation2] sm:$0xf] %vm768_vm5, %v766_v62 }
 0x639   : > { %v885_v63 = vpop.permute.xlu1 %884 }
 0x63a   : > { %888 = vst.msk [vmem:[#allocation2] sm:$0xf] %vm887_vm6, %v885_v63 }
 0x641   : > { %v1004_v1 = vpop.permute.xlu0 %1003 }
 0x642   : > { %1007 = vst.msk [vmem:[#allocation2] sm:$0xf] %vm1006_vm7, %v1004_v1 }
 0x649   : > { %v1008_v2 = vld [vmem:[#allocation2] sm:$0xf] }
 0x64a   : > { %1479 = vmatmul.mubr.msk.bf16.vlgmr.msra.gmra.mrb[16].mxu1 %vm440_vm0, %v1008_v2 }
 0x64b   : > { %1498 = vmatprep.mubr.msk.bf16.mxu1 %vm1656_vm1, %v1655_v8  ;;  %1491 = vmatpush3.bf16.msra.mxu1 %v1563_v28 }
 0x64c   : > { %1492 = vmatprep.subr.bf16.mxu1 %v1655_v8 }
 0x64f   : > { %1493 = vmatpush3.bf16.msra.mxu1 %v1564_v29 }
 0x650   : > { %1494 = vmatprep.subr.bf16.mxu1 %v1655_v8 }
 0x653   : > { %1495 = vmatpush3.bf16.msra.mxu1 %v1565_v30 }
 0x654   : > { %1496 = vmatprep.subr.bf16.mxu1 %v1655_v8 }
 0x657   : > { %1497 = vmatpush3.bf16.msra.mxu1 %v1566_v31 }
 0x71d   : > { %v1069_v4 = vpop.f32.mrb[16].mxu1 }
 0x71e   : > { %v1070_v5 = vadd.f32 %v1365_v3, %v1069_v4  ;;  %v1480_v6 = vpop.f32.mrb[17].mxu1 }
 0x71f   : > { %v1072_v7 = vpop.f32.mrb[18].mxu1 }
 0x720   : > { %v1904_v9 = vadd.f32 %v1070_v5, %v1795_v0  ;;  %v1481_v10 = vpop.f32.mrb[19].mxu1  ;;  %v1562_v0 = vld [vmem:[%s2003_s9 + $0x8] sm:$0xff]  }
 0x721   : > { %1485 = vmatpush3.bf16.msra.mxu0 %v1562_v0 }
 0x722   : > { %v1078_v11 = vsel %vm440_vm0, %v1904_v9, 0.0 }
 0x723   : > { %1079 = vadd.xlane.f32.xlu1 %v1078_v11 }
 0x7b0   : > { %v1080_v12 = vpop.xlane.xlu1 %1079 }
 0x7b1   : > { %v1081_v13 = vmul.f32 0.03125, %v1080_v12 }
 0x7b3   : > { %v1082_v14 = vsub.f32 %v1904_v9, %v1081_v13 }
 0x7b5   : > { %v1083_v15 = vmul.f32 %v1082_v14, %v1082_v14 }
 0x7b7   : > { %v1084_v16 = vsel %vm440_vm0, %v1083_v15, 0.0 }
 0x7b8   : > { %1085 = vadd.xlane.f32.xlu0 %v1084_v16 }
 0x845   : > { %v1086_v18 = vpop.xlane.xlu0 %1085 }
 0x846   : > { %v1087_v19 = vmul.f32 0.03125, %v1086_v18 }
 0x848   : > { %v1088_v20 = vadd.f32 1e-05, %v1087_v19 }
 0x84a   : > { %1585 = vrsqrt.f32 %v1088_v20 }
 0x854   : > { %v1586_v21 = vpop.eup %1585 }
 0x855   : > { %v1090_v23 = vmul.f32 %v1586_v21, %v1082_v14 }
 0x857   : > { %v1097_v25 = vmul.f32 %v1369_v22, %v1090_v23 }
 0x859   : > { %v1104_v26 = vadd.f32 %v1370_v24, %v1097_v25 }
 0x85b   : > { %v1105_v27 = vpack.c.bf16 %v1104_v26, %v1104_v26 }
 0x85d   : > { %1487 = vmatmul.mubr.msk.bf16.vlgmr.msra.gmra.mrb[20].mxu0 %vm440_vm0, %v1105_v27 }
 0x930   : > { %v1166_v33 = vpop.f32.mrb[20].mxu0 }
 0x931   : > { %v1167_v34 = vadd.f32 %v1371_v32, %v1166_v33  ;;  %v1488_v35 = vpop.f32.mrb[21].mxu0 }
 0x932   : > { %v1169_v36 = vpop.f32.mrb[22].mxu0 }
 0x933   : > { %v1172_v37 = vmul.f32 1.702, %v1167_v34  ;;  %v1489_v38 = vpop.f32.mrb[23].mxu0 }
 0x935   : > { %v1173_v39 = vand.u32 2147483647, %v1172_v37  ;;  %vm1179_vm8 = vcmp.ge.f32.partialorder %v1172_v37, 0.0 }
 0x937   : > { %v1174_v40 = vsub.f32 0.0, %v1173_v39 }
 0x939   : > { %v1175_v41 = vmul.f32 1.442695, %v1174_v40 }
 0x93b   : > { %1587 = vpow2.f32 %v1175_v41 }
 0x945   : > { %v1588_v8 = vpop.eup %1587 }
 0x946   : > { %v1177_v42 = vadd.f32 1.0, %v1588_v8 }
 0x948   : > { %1589 = vrcp.f32 %v1177_v42 }
 0x952   : > { %v1590_v43 = vpop.eup %1589 }
 0x953   : > { %v1180_v44 = vmul.f32 %v1590_v43, %v1588_v8 }
 0x955   : > { %v1181_v45 = vsel %vm1179_vm8, %v1590_v43, %v1180_v44 }
 0x956   : > { %v1182_v46 = vmul.f32 %v1181_v45, %v1167_v34 }
 0x958   : > { %v1183_v47 = vpack.c.bf16 %v1182_v46, %v1182_v46 }
 0x95a   : > { %1499 = vmatmul.mubr.msk.bf16.vlgmr.msra.gmra.mrb[20].mxu1 %vm1223_vm9, %v1183_v47 }
 0xa2d   : > { %v1261_v49 = vpop.f32.mrb[20].mxu1 }
 0xa2e   : > { %v1262_v50 = vadd.f32 %v1375_v48, %v1261_v49  ;;  %v1500_v51 = vpop.f32.mrb[21].mxu1 }
 0xa2f   : > { %v1264_v52 = vpop.f32.mrb[22].mxu1 }
 0xa30   : > { %v1267_v53 = vadd.f32 %v1262_v50, %v1904_v9  ;;  %v1501_v54 = vpop.f32.mrb[23].mxu1 }
 0xa32   : > { %1268 = vst.msk [vmem:[%s431_s22] sm:$0xff] %vm440_vm0, %v1267_v53 }
 0xa33   : > { %1604 = shalt.err (!%p1601_p3)
}
 0xa34   : > { %s1605_s0 = scalar_lea.hbm %s1951_s1, 128  ;;  %s1609_s22 = scalar_lea.hbm %s2007_s13, 256 }
 0xa35   : > { %p1606_p4 = scmp.ne.s32.totalorder %s1951_s1, %s1605_s0  ;;  %p1610_p9 = scmp.lt.u32.totalorder %s1951_s1, %s2007_s13 }
 0xa36   : > { %p1611_p10 = scmp.lt.u32.totalorder %s1609_s22, %s1605_s0  ;;  %p1613_p12 = scmp.lt.u32.totalorder %s1605_s0, %s1951_s1 }
 0xa37   : > { %p1607_p7 = pnand %p1606_p4, %p1780_p5 }
 0xa38   : > { %p1612_p11 = por %p1611_p10, %p1610_p9 }
 0xa39   : > { %p1608_p8 = pneg %p1607_p7 }
 0xa3a   : > { %p1614_p13 = por %p1613_p12, %p1612_p11 }
 0xa3c   : > { %p1615_p0 = pnand %p1614_p13, %p1608_p8 }
 0xa3e   : > { %1618 = shalt.err (!%p1615_p0)
}
 0xa3f   : > { %1502 = dma.vmem_to_hbm [thread:$0]  (%p1780_p5), %s1953_s23, 128, %s1951_s1, %s1270_s29  }
 0xa40 PF: > { %p1508_p1 = scmp.ge.s32.totalorder %s1653_s28, 2  ;;  %s1295_s2 = sand.u32 1, %s1641_s25  }
 0xa41   : > { %s1296_s15 = scalar_lea.sflag [#allocation4], %s1295_s2 }
 0xa42   : > { %p1505_p2 = pnand %p1508_p1, %p1784_p6 }
 0xa44   : > { %1636 = dma.done.wait (!%p1505_p2), %s1296_s15, 128  }
 0xa45   : > { %1638 = vsyncadd (!%p1505_p2), %s1296_s15, 4294967168  ;;  %p23_p3 = scmp.ge.s32.totalorder %s1767_s14, 4   ;;  %s2016_s25 = smov %s1645_s26 }
 0xa46   : > { %s2017_s26 = smov %s1649_s27  ;;  %s2018_s27 = smov %s1778_s17 }
 0xa47   : > { %s2019_s28 = smov %s1767_s14  ;;  %25 = sbr.rel (!%p23_p3) target bundleno = 7 (0x7), region = 107 }
 0xa4e   :  { %1301 = vsyncpa [#allocation4], 1 }
 0xa4f   :  { %1303 = vsyncpa [#allocation4 + $0x1], 1 }

// kernel: clip_encoder.2
= control target key start
LH: loop header
LB: loop body
LE: loop exit
PB: predicated region body
PF: predicated region fallthrough
CT: control target
= control target key end

     0   :  { %18 = vsyncpa [#allocation4], 0  ;;  %s2371_s0 = inlined_call_operand.vmem [shape: f32[2,8,32], index: 0, kind: input, shape index: {}]   ;;  %s2372_s1 = inlined_call_operand.vmem [shape: f32[1,32], index: 1, kind: input, shape index: {}]   ;;  %s2373_s2 = inlined_call_operand.vmem [shape: f32[1,32], index: 2, kind: input, shape index: {}]   ;;  %s2374_s3 = inlined_call_operand.vmem [shape: bf16[32,96], index: 3, kind: input, shape index: {}]   ;;  %s2375_s4 = inlined_call_operand.hbm [shape: f32[1,96], index: 4, kind: input, shape index: {}]   ;;  %s2376_s5 = inlined_call_operand.vmem [shape: bf16[32,32], index: 5, kind: input, shape index: {}]   ;;  %s2377_s6 = inlined_call_operand.hbm [shape: f32[1,32], index: 6, kind: input, shape index: {}]   ;;  %s2378_s7 = inlined_call_operand.hbm [shape: f32[1,32], index: 7, kind: input, shape index: {}]   ;;  %s2379_s8 = inlined_call_operand.hbm [shape: f32[1,32], index: 8, kind: input, shape index: {}]   ;;  %s2380_s9 = inlined_call_operand.vmem [shape: bf16[32,64], index: 9, kind: input, shape index: {}]   ;;  %s2381_s10 = inlined_call_operand.hbm [shape: f32[1,64], index: 10, kind: input, shape index: {}]   ;;  %s2382_s11 = inlined_call_operand.vmem [shape: bf16[64,32], index: 11, kind: input, shape index: {}]   ;;  %s2383_s12 = inlined_call_operand.hbm [shape: f32[1,32], index: 12, kind: input, shape index: {}]   ;;  %s2384_s13 = inlined_call_operand.vmem [shape: f32[2,8,32], index: 13, kind: output, shape index: {}]  }
   0x1   :  { %19 = vsyncpa [#allocation6], 0 }
   0x2   :  { %20 = vsyncpa [#allocation9], 0 }
   0x3   :  { %21 = vsyncpa [#allocation12], 0  ;;  %s2032_s25 = smov 0  }
   0x4 LB: > { %2388 = sst [smem:[#allocation17_spill]] %s1938_s25  ;;  %s1940_s26 = smov [#allocation5]   ;;  %s1938_s25 = sphi %s2032_s25, %s27_s25  }
   0x5   : > { %s372_s27 = sshll.u32 %s1940_s26, 4  ;;  %s2038_s28 = sadd.s32 4294967295, %s1938_s25   ;;  %s2043_s27 = int_to_ptr.vmem [resolvable:$true] %s372_s27 }
   0x6   : > { %p1460_p0 = scmp.ge.s32.totalorder %s1938_s25, 1  ;;  %p336_p1 = scmp.lt.s32.totalorder %s1938_s25, 3 }
   0x7   : > { %p2386_p2 = scmp.eq.s32.totalorder %s2038_s28, 0  ;;  %s1941_s30 = smov [#allocation8]  }
   0x8   : > { %p2045_p3 = pnand %p1460_p0, %p336_p1  ;;  %s394_s14 = sshll.u32 %s1941_s30, 4  ;;  %s2051_s14 = int_to_ptr.vmem [resolvable:$true] %s394_s14 }
   0x9   : > { %s1942_s15 = smov [#allocation3]   ;;  %s1943_s18 = smov [#allocation7]  }
   0xa   : > { %s2389_s29 = scalar_select %p2045_p3, 1, 0 }
   0xb   : > { %p1653_p4 = pneg %p2045_p3  ;;  %s358_s16 = sshll.u32 %s1942_s15, 4  ;;  %s2059_s16 = int_to_ptr.vmem [resolvable:$true] %s358_s16 }
   0xc   : > { %s383_s19 = sshll.u32 %s1943_s18, 4  ;;  %s1748_s22 = scalar_lea.hbm %s2377_s6, 16  ;;  %s2061_s19 = int_to_ptr.vmem [resolvable:$true] %s383_s19 }
   0xd   : > { %p2055_p5 = pnand %p2386_p2, %p1653_p4  ;;  %p1749_p6 = scmp.ne.s32.totalorder %s2377_s6, %s1748_s22 }
   0xe   : > { %p1755_p10 = scmp.lt.u32.totalorder %s1748_s22, %s2377_s6 }
   0xf   : > { %p2071_p7 = pneg %p2055_p5 }
  0x11   : > { %p1751_p8 = pnand %p2071_p7, %p1749_p6 }
  0x13   : > { %p1752_p9 = pneg %p1751_p8 }
  0x15   : > { %p1757_p11 = pnand %p1755_p10, %p1752_p9 }
  0x17   : > { %1760 = shalt.err (!%p1757_p11)
}
  0x18   : > { %s1761_s18 = scalar_lea.vmem %s2043_s27, 16  ;;  %s1768_s20 = scalar_lea.vmem %s2043_s27, 32 }
  0x19   : > { %p1762_p12 = scmp.ne.s32.totalorder %s2043_s27, %s1761_s18  ;;  %p1769_p1 = scmp.lt.s32.totalorder %s2043_s27, %s2043_s27 }
  0x1a   : > { %p1770_p4 = scmp.lt.s32.totalorder %s1768_s20, %s1761_s18 }
  0x1b   : > { %p1764_p13 = pnand %p1762_p12, %p2071_p7 }
  0x1c   : > { %p1771_p6 = por %p1770_p4, %p1769_p1 }
  0x1d   : > { %p1765_p0 = pneg %p1764_p13 }
  0x1f   : > { %p1772_p8 = pnand %p1771_p6, %p1765_p0 }
  0x21   : > { %1775 = shalt.err (!%p1772_p8)
}
  0x22   : > { %1659 = dma.hbm_to_vmem [thread:$0]  (!%p2055_p5), %s2377_s6, 16, %s2043_s27, [#allocation6]  }
  0x23   : > { %s1776_s30 = scalar_lea.hbm %s2379_s8, 16 }
  0x24   : > { %p1777_p9 = scmp.ne.s32.totalorder %s2379_s8, %s1776_s30  ;;  %p1783_p12 = scmp.lt.u32.totalorder %s1776_s30, %s2379_s8 }
  0x26   : > { %p1779_p10 = pnand %p1777_p9, %p2071_p7 }
  0x28   : > { %p1780_p11 = pneg %p1779_p10 }
  0x2a   : > { %p1785_p13 = pnand %p1783_p12, %p1780_p11 }
  0x2c   : > { %1788 = shalt.err (!%p1785_p13)
}
  0x2d   : > { %s1789_s27 = scalar_lea.vmem %s2051_s14, 16  ;;  %s1796_s25 = scalar_lea.vmem %s2051_s14, 32 }
  0x2e   : > { %p1790_p0 = scmp.ne.s32.totalorder %s2051_s14, %s1789_s27  ;;  %p1797_p6 = scmp.lt.s32.totalorder %s2051_s14, %s2051_s14 }
  0x2f   : > { %p1798_p8 = scmp.lt.s32.totalorder %s1796_s25, %s1789_s27 }
  0x30   : > { %p1792_p1 = pnand %p1790_p0, %p2071_p7 }
  0x31   : > { %p1799_p9 = por %p1798_p8, %p1797_p6 }
  0x32   : > { %p1793_p4 = pneg %p1792_p1 }
  0x34   : > { %p1800_p10 = pnand %p1799_p9, %p1793_p4 }
  0x36   : > { %1803 = shalt.err (!%p1800_p10)
}
  0x37   : > { %1665 = dma.hbm_to_vmem [thread:$0]  (!%p2055_p5), %s2379_s8, 16, %s2051_s14, [#allocation9]  }
  0x38   : > { %s1804_s30 = scalar_lea.hbm %s2375_s4, 16 }
  0x39   : > { %p1805_p11 = scmp.ne.s32.totalorder %s2375_s4, %s1804_s30  ;;  %p1811_p0 = scmp.lt.u32.totalorder %s1804_s30, %s2375_s4 }
  0x3b   : > { %p1807_p12 = pnand %p1805_p11, %p2071_p7 }
  0x3d   : > { %p1808_p13 = pneg %p1807_p12 }
  0x3f   : > { %p1813_p1 = pnand %p1811_p0, %p1808_p13 }
  0x41   : > { %1816 = shalt.err (!%p1813_p1)
}
  0x42   : > { %s1817_s14 = scalar_lea.vmem %s2059_s16, 16  ;;  %s1824_s25 = scalar_lea.vmem %s2059_s16, 32 }
  0x43   : > { %p1818_p4 = scmp.ne.s32.totalorder %s2059_s16, %s1817_s14  ;;  %p1825_p9 = scmp.lt.s32.totalorder %s2059_s16, %s2059_s16 }
  0x44   : > { %p1826_p10 = scmp.lt.s32.totalorder %s1824_s25, %s1817_s14 }
  0x45   : > { %p1820_p6 = pnand %p1818_p4, %p2071_p7 }
  0x46   : > { %p1827_p11 = por %p1826_p10, %p1825_p9 }
  0x47   : > { %p1821_p8 = pneg %p1820_p6 }
  0x49   : > { %p1828_p12 = pnand %p1827_p11, %p1821_p8 }
  0x4b   : > { %1831 = shalt.err (!%p1828_p12)
}
  0x4c   : > { %1656 = dma.hbm_to_vmem [thread:$0]  (!%p2055_p5), %s2375_s4, 16, %s2059_s16, [#allocation4]  }
  0x4d   : > { %s1832_s30 = scalar_lea.hbm %s2378_s7, 16 }
  0x4e   : > { %p1833_p13 = scmp.ne.s32.totalorder %s2378_s7, %s1832_s30  ;;  %p1839_p4 = scmp.lt.u32.totalorder %s1832_s30, %s2378_s7 }
  0x50   : > { %p1835_p0 = pnand %p1833_p13, %p2071_p7 }
  0x52   : > { %p1836_p1 = pneg %p1835_p0 }
  0x54   : > { %p1841_p6 = pnand %p1839_p4, %p1836_p1 }
  0x56   : > { %1844 = shalt.err (!%p1841_p6)
}
  0x57   : > { %s1845_s16 = scalar_lea.vmem %s2061_s19, 16  ;;  %s1852_s14 = scalar_lea.vmem %s2061_s19, 32 }
  0x58   : > { %p1846_p8 = scmp.ne.s32.totalorder %s2061_s19, %s1845_s16  ;;  %p1853_p11 = scmp.lt.s32.totalorder %s2061_s19, %s2061_s19 }
  0x59   : > { %p1854_p12 = scmp.lt.s32.totalorder %s1852_s14, %s1845_s16 }
  0x5a   : > { %p1848_p9 = pnand %p1846_p8, %p2071_p7 }
  0x5b   : > { %p1855_p13 = por %p1854_p12, %p1853_p11 }
  0x5c   : > { %p1849_p10 = pneg %p1848_p9 }
  0x5e   : > { %p1856_p0 = pnand %p1855_p13, %p1849_p10 }
  0x60   : > { %1859 = shalt.err (!%p1856_p0)
}
  0x61   : > { %1662 = dma.hbm_to_vmem [thread:$0]  (!%p2055_p5), %s2378_s7, 16, %s2061_s19, [#allocation6]  }
  0x62   : > { %s1944_s22 = smov [#allocation10]   ;;  %s1945_s24 = smov [#allocation11]  }
  0x63   : > { %s408_s23 = sshll.u32 %s1944_s22, 4  ;;  %s422_s30 = sshll.u32 %s1945_s24, 4  ;;  %s409_s23 = int_to_ptr.vmem [resolvable:$true] %s408_s23  ;;  %s423_s30 = int_to_ptr.vmem [resolvable:$true] %s422_s30 }
  0x64   : > { %s1860_s20 = scalar_lea.hbm %s2381_s10, 16 }
  0x65   : > { %p1861_p1 = scmp.ne.s32.totalorder %s2381_s10, %s1860_s20  ;;  %p1867_p8 = scmp.lt.u32.totalorder %s1860_s20, %s2381_s10 }
  0x67   : > { %p1863_p4 = pnand %p1861_p1, %p2071_p7 }
  0x69   : > { %p1864_p6 = pneg %p1863_p4 }
  0x6b   : > { %p1869_p9 = pnand %p1867_p8, %p1864_p6 }
  0x6d   : > { %1872 = shalt.err (!%p1869_p9)
}
  0x6e   : > { %s1873_s19 = scalar_lea.vmem %s409_s23, 16  ;;  %s1880_s21 = scalar_lea.vmem %s409_s23, 32 }
  0x6f   : > { %p1874_p10 = scmp.ne.s32.totalorder %s409_s23, %s1873_s19  ;;  %p1881_p13 = scmp.lt.s32.totalorder %s409_s23, %s409_s23 }
  0x70   : > { %p1882_p0 = scmp.lt.s32.totalorder %s1880_s21, %s1873_s19 }
  0x71   : > { %p1876_p11 = pnand %p1874_p10, %p2071_p7 }
  0x72   : > { %p1883_p2 = por %p1882_p0, %p1881_p13 }
  0x73   : > { %p1877_p12 = pneg %p1876_p11 }
  0x75   : > { %p1884_p3 = pnand %p1883_p2, %p1877_p12 }
  0x77   : > { %1887 = shalt.err (!%p1884_p3)
}
  0x78   : > { %1668 = dma.hbm_to_vmem [thread:$0]  (!%p2055_p5), %s2381_s10, 16, %s409_s23, [#allocation9]  }
  0x79   : > { %s1888_s20 = scalar_lea.hbm %s2383_s12, 16 }
  0x7a   : > { %p1889_p1 = scmp.ne.s32.totalorder %s2383_s12, %s1888_s20  ;;  %p1895_p3 = scmp.lt.u32.totalorder %s1888_s20, %s2383_s12 }
  0x7c   : > { %p1891_p4 = pnand %p1889_p1, %p2071_p7 }
  0x7e   : > { %p1892_p2 = pneg %p1891_p4 }
  0x80   : > { %p1897_p6 = pnand %p1895_p3, %p1892_p2 }
  0x82   : > { %1900 = shalt.err (!%p1897_p6)
}
  0x83   : > { %s1901_s19 = scalar_lea.vmem %s423_s30, 16  ;;  %s1908_s23 = scalar_lea.vmem %s423_s30, 32 }
  0x84   : > { %p1902_p8 = scmp.ne.s32.totalorder %s423_s30, %s1901_s19  ;;  %p1909_p11 = scmp.lt.s32.totalorder %s423_s30, %s423_s30 }
  0x85   : > { %p1910_p12 = scmp.lt.s32.totalorder %s1908_s23, %s1901_s19 }
  0x86   : > { %p1904_p9 = pnand %p1902_p8, %p2071_p7 }
  0x87   : > { %p1911_p13 = por %p1910_p12, %p1909_p11 }
  0x88   : > { %p1905_p10 = pneg %p1904_p9 }
  0x8a   : > { %p1912_p0 = pnand %p1911_p13, %p1905_p10 }
  0x8c   : > { %1915 = shalt.err (!%p1912_p0)
}
  0x8d   : > { %1671 = dma.hbm_to_vmem [thread:$0]  (!%p2055_p5), %s2383_s12, 16, %s423_s30, [#allocation12]  }
  0x8e   : > { %p2392_p1 = scmp.ne.s32.totalorder %s2389_s29, 0 }
  0x8f   : > { %p2393_p4 = scmp.eq.s32.totalorder (!%p2392_p1), %s2038_s28, 0 }
  0x90   : > { %442 = sbr.rel (%p2392_p1) target bundleno = 2748 (0xabc), region = 72 }
  0x97   : > { %1921 = dma.done.wait (%p2393_p4), [#allocation4], 16   ;;  %p2394_p7 = pmov %p2393_p4 }
  0x98   : > { %p2395_p2 = pmov %p2393_p4 }
  0x99   : > { %1923 = vsyncadd (%p2394_p7), [#allocation4], 4294967280 }
  0x9a   : > { %1925 = dma.done.wait (%p2395_p2), [#allocation6], 32   ;;  %p2396_p3 = pmov %p2395_p2 }
  0x9b   : > { %p2397_p6 = pmov %p2395_p2 }
  0x9c   : > { %1927 = vsyncadd (%p2396_p3), [#allocation6], 4294967264 }
  0x9d   : > { %1929 = dma.done.wait (%p2397_p6), [#allocation9], 32   ;;  %p2398_p5 = pmov %p2395_p2 }
  0x9e   : > { %p2399_p8 = pmov %p2395_p2 }
  0x9f   : > { %1931 = vsyncadd (%p2398_p5), [#allocation9], 4294967264 }
  0xa0   : > { %1933 = dma.done.wait (%p2399_p8), [#allocation12], 16   ;;  %p2400_p9 = pmov %p2395_p2 }
  0xa1   : > { %p504_p10 = scmp.lt.s32.totalorder %s2038_s28, 1  ;;  %vm516_vm0 = vcmask 261120   ;;  %v1714_v7 = vld [vmem:[%s2374_s3] sm:$0xff]   ;;  %v1946_v8 = vmov 0.0   ;;  %vm1947_vm1 = vmmov 0   ;;  %v1715_v9 = vld [vmem:[%s2374_s3 + $0x8] sm:$0xff]  }
  0xa2   : > { %1935 = vsyncadd (%p2400_p9), [#allocation12], 4294967280  ;;  %1545 = vmatprep.subr.bf16.mxu0 %v1946_v8  ;;  %1549 = vmatprep.mubr.msk.bf16.mxu0 %vm1947_vm1, %v1946_v8  ;;  %v1477_v14 = vld [vmem:[%s2372_s1] ss:$0 sm:$0xff]  ;;  %v1479_v20 = vld [vmem:[#allocation3] ss:$0 sm:$0xff] }
  0xa3   : > { %s2403_s28 = smov (!%p504_p10, %s2038_s28), 1  ;;  %1546 = vmatpush3.bf16.msra.mxu0 %v1714_v7  ;;  %1553 = vmatprep.subr.bf16.mxu1 %v1946_v8  ;;  %v1478_v16 = vld [vmem:[%s2373_s2] ss:$0 sm:$0xff]  ;;  %s1948_s19 = smov 120   ;;  %vm616_vm2 = vcmask 64512   ;;  %vm680_vm3 = vcmask 1043456  }
  0xa4   : > { %s1475_s29 = sshll.u32 %s2403_s28, 3  ;;  %1547 = vmatprep.subr.bf16.mxu0 %v1946_v8  ;;  %1555 = vmatprep.mubr.msk.bf16.mxu1 %vm1947_vm1, %v1946_v8  ;;  %s1949_s23 = smov 96   ;;  %vm725_vm4 = vcmask 60416   ;;  %vm844_vm5 = vcmask 126016   ;;  %vm963_vm6 = vcmask 191616   ;;  %vm1082_vm7 = vcmask 257216  }
  0xa5   : > { %s507_s30 = scalar_lea.vmem %s2371_s0, %s1475_s29  ;;  %s1950_s21 = smov 88   ;;  %vm1299_vm9 = vcmask 523264  }
  0xa6   : > { %v2229_v0 = vld [vmem:[%s507_s30] sm:$0xff]  ;;  %s1951_s22 = smov 80   ;;  %s1952_s17 = smov 112  }
  0xa7   : > { %v517_v1 = vsel %vm516_vm0, %v2229_v0, 0.0  ;;  %1548 = vmatpush3.bf16.msra.mxu0 %v1715_v9  ;;  %s1953_s26 = smov 72   ;;  %s1954_s30 = smov 104  }
  0xa8   : > { %518 = vadd.xlane.f32.xlu0 %v517_v1  ;;  %1559 = vmatprep.subr.bf16.mxu0 %v1946_v8  ;;  %s1955_s24 = smov 64   ;;  %s1956_s15 = smov 56  }
  0xa9   : > { %s1957_s18 = smov 48   ;;  %s1958_s20 = smov 40  }
  0xaa   : > { %s1959_s27 = smov 8  }
 0x135   : > { %v519_v2 = vpop.xlane.xlu0 %518 }
 0x136   : > { %v521_v3 = vmul.f32 0.03125, %v519_v2 }
 0x138   : > { %v522_v4 = vsub.f32 %v2229_v0, %v521_v3 }
 0x13a   : > { %v523_v5 = vmul.f32 %v522_v4, %v522_v4 }
 0x13c   : > { %v524_v6 = vsel %vm516_vm0, %v523_v5, 0.0 }
 0x13d   : > { %525 = vadd.xlane.f32.xlu0 %v524_v6 }
 0x1ca   : > { %v526_v10 = vpop.xlane.xlu0 %525 }
 0x1cb   : > { %v527_v11 = vmul.f32 0.03125, %v526_v10 }
 0x1cd   : > { %v528_v12 = vadd.f32 1e-05, %v527_v11 }
 0x1cf   : > { %1724 = vrsqrt.f32 %v528_v12 }
 0x1d9   : > { %v1725_v13 = vpop.eup %1724 }
 0x1da   : > { %v530_v15 = vmul.f32 %v1725_v13, %v522_v4 }
 0x1dc   : > { %v537_v17 = vmul.f32 %v1477_v14, %v530_v15 }
 0x1de   : > { %v544_v18 = vadd.f32 %v1478_v16, %v537_v17 }
 0x1e0   : > { %v545_v19 = vpack.c.bf16 %v544_v18, %v544_v18 }
 0x1e2   : > { %1550 = vmatmul.mubr.msk.bf16.vlgmr.msra.gmra.mrb[0].mxu0 %vm516_vm0, %v545_v19 }
 0x1e3   : > { %1561 = vmatprep.mubr.msk.bf16.mxu0 %vm1947_vm1, %v1946_v8 }
 0x2b5   : > { %v606_v21 = vpop.f32.mrb[0].mxu0 }
 0x2b6   : > { %v607_v22 = vadd.f32 %v1479_v20, %v606_v21  ;;  %v1551_v23 = vpop.f32.mrb[1].mxu0 }
 0x2b7   : > { %v609_v24 = vpop.f32.mrb[2].mxu0 }
 0x2b8   : > { %v2258_v25 = vpack.c.bf16 %v607_v22, %v607_v22  ;;  %v1552_v26 = vpop.f32.mrb[3].mxu0 }
 0x2ba   : > { %727 = vrot.lane.b32.xlu0 %v2258_v25, %s1948_s19  ;;  %614 = vrot.lane.b32.xlu1 %v2258_v25, %s1949_s23  ;;  %s1960_s23 = smov 16  }
 0x2be   : > { %729 = vrot.lane.b32.xlu1 %v2258_v25, %s1950_s21  ;;  %s1961_s21 = smov 24  }
 0x2c2   : > { %848 = vrot.lane.b32.xlu1 %v2258_v25, %s1951_s22 }
 0x2c6   : > { %846 = vrot.lane.b32.xlu1 %v2258_v25, %s1952_s17 }
 0x2ca   : > { %967 = vrot.lane.b32.xlu1 %v2258_v25, %s1953_s26 }
 0x2ce   : > { %965 = vrot.lane.b32.xlu1 %v2258_v25, %s1954_s30 }
 0x32c   : > { %v615_v27 = vpop.permute.xlu1 %614  ;;  %v728_v32 = vpop.permute.xlu0 %727 }
 0x32d   : > { %v621_v28 = vsel %vm616_vm2, %v615_v27, 0 }
 0x32e   : > { %1554 = vmatpush3.bf16.xpose.msra.mxu1 %v621_v28 }
 0x32f   : > { %1565 = vmatprep.subr.bf16.mxu1 %v1946_v8 }
 0x330   : > { %v730_v29 = vpop.permute.xlu1 %729 }
 0x331   : > { %v735_v30 = vsel %vm616_vm2, %v730_v29, 0 }
 0x334   : > { %v849_v31 = vpop.permute.xlu1 %848 }
 0x335   : > { %1556 = vmatmul.mubr.msk.bf16.vlgmr.msra.gmra.mrb[0].mxu1 %vm616_vm2, %v2258_v25  ;;  %v854_v34 = vsel %vm616_vm2, %v849_v31, 0 }
 0x336   : > { %1566 = vmatpush3.bf16.xpose.msra.mxu1 %v735_v30  ;;  %1567 = vmatprep.mubr.msk.bf16.mxu1 %vm1947_vm1, %v1946_v8 }
 0x337   : > { %1577 = vmatprep.subr.bf16.mxu1 %v1946_v8 }
 0x338   : > { %v847_v33 = vpop.permute.xlu1 %846 }
 0x33c   : > { %v968_v35 = vpop.permute.xlu1 %967 }
 0x33d   : > { %1568 = vmatmul.mubr.msk.bf16.vlgmr.msra.gmra.mrb[4].mxu1 %vm616_vm2, %v728_v32  ;;  %v973_v36 = vsel %vm616_vm2, %v968_v35, 0 }
 0x33e   : > { %1578 = vmatpush3.bf16.xpose.msra.mxu1 %v854_v34  ;;  %1579 = vmatprep.mubr.msk.bf16.mxu1 %vm1947_vm1, %v1946_v8 }
 0x33f   : > { %1589 = vmatprep.subr.bf16.mxu1 %v1946_v8 }
 0x340   : > { %v966_v37 = vpop.permute.xlu1 %965 }
 0x345   : > { %1580 = vmatmul.mubr.msk.bf16.vlgmr.msra.gmra.mrb[8].mxu1 %vm616_vm2, %v847_v33 }
 0x346   : > { %1590 = vmatpush3.bf16.xpose.msra.mxu1 %v973_v36  ;;  %1591 = vmatprep.mubr.msk.bf16.mxu1 %vm1947_vm1, %v1946_v8 }
 0x347   : > { %1601 = vmatprep.subr.bf16.mxu1 %v1946_v8 }
 0x34d   : > { %1592 = vmatmul.mubr.msk.bf16.vlgmr.msra.gmra.mrb[12].mxu1 %vm616_vm2, %v966_v37 }
 0x34e   : > { %1605 = vmatprep.mubr.msk.bf16.mxu1 %vm1947_vm1, %v1946_v8 }
 0x408   : > { %v657_v38 = vpop.f32.mrb[0].mxu1 }
 0x409   : > { %v1557_v39 = vpop.f32.mrb[1].mxu1  ;;  %v663_v40 = vsel %vm616_vm2, %v657_v38, -inf }
 0x40a   : > { %664 = vmax.xlane.f32.xlu1 %v663_v40  ;;  %v660_v41 = vpop.f32.mrb[2].mxu1 }
 0x40b   : > { %v1558_v42 = vpop.f32.mrb[3].mxu1 }
 0x410   : > { %v771_v43 = vpop.f32.mrb[4].mxu1 }
 0x411   : > { %v1569_v44 = vpop.f32.mrb[5].mxu1  ;;  %v777_v45 = vsel %vm616_vm2, %v771_v43, -inf }
 0x412   : > { %778 = vmax.xlane.f32.xlu0 %v777_v45  ;;  %v774_v46 = vpop.f32.mrb[6].mxu1 }
 0x413   : > { %v1570_v47 = vpop.f32.mrb[7].mxu1 }
 0x418   : > { %v890_v48 = vpop.f32.mrb[8].mxu1 }
 0x419   : > { %v1581_v49 = vpop.f32.mrb[9].mxu1  ;;  %v896_v50 = vsel %vm616_vm2, %v890_v48, -inf }
 0x41a   : > { %897 = vmax.xlane.f32.xlu1 %v896_v50  ;;  %v893_v51 = vpop.f32.mrb[10].mxu1  ;;  %v1716_v50 = vld [vmem:[%s2376_s5] sm:$0xff]  }
 0x41b   : > { %v1582_v52 = vpop.f32.mrb[11].mxu1  ;;  %1602 = vmatpush3.bf16.msra.mxu1 %v1716_v50 }
 0x41c   : > { %v1717_v52 = vld [vmem:[%s2376_s5 + $0x8] sm:$0xff]   ;;  %1603 = vmatprep.subr.bf16.mxu1 %v1946_v8 }
 0x41f   : > { %1604 = vmatpush3.bf16.msra.mxu1 %v1717_v52 }
 0x420   : > { %v1009_v53 = vpop.f32.mrb[12].mxu1  ;;  %1617 = vmatprep.subr.bf16.mxu1 %v1946_v8 }
 0x421   : > { %v1593_v54 = vpop.f32.mrb[13].mxu1  ;;  %v1015_v55 = vsel %vm616_vm2, %v1009_v53, -inf }
 0x422   : > { %1016 = vmax.xlane.f32.xlu0 %v1015_v55  ;;  %v1012_v56 = vpop.f32.mrb[14].mxu1 }
 0x423   : > { %v1594_v57 = vpop.f32.mrb[15].mxu1 }
 0x497   : > { %v665_v58 = vpop.xlane.xlu1 %664 }
 0x498   : > { %v666_v59 = vsub.f32 %v657_v38, %v665_v58 }
 0x49a   : > { %v667_v60 = vmul.f32 1.442695, %v666_v59 }
 0x49c   : > { %1726 = vpow2.f32 %v667_v60 }
 0x49f   : > { %v779_v61 = vpop.xlane.xlu0 %778 }
 0x4a0   : > { %v780_v62 = vsub.f32 %v771_v43, %v779_v61 }
 0x4a2   : > { %v781_v63 = vmul.f32 1.442695, %v780_v62 }
 0x4a4   : > { %1728 = vpow2.f32 %v781_v63 }
 0x4a6   : > { %v1727_v1 = vpop.eup %1726 }
 0x4a7   : > { %v669_v2 = vsel %vm616_vm2, %v1727_v1, 0.0  ;;  %v898_v11 = vpop.xlane.xlu1 %897 }
 0x4a8   : > { %670 = vadd.xlane.f32.xlu1 %v669_v2  ;;  %v899_v12 = vsub.f32 %v890_v48, %v898_v11 }
 0x4aa   : > { %v900_v13 = vmul.f32 1.442695, %v899_v12 }
 0x4ae   : > { %v1729_v3 = vpop.eup %1728 }
 0x4af   : > { %v1017_v4 = vpop.xlane.xlu0 %1016  ;;  %v783_v5 = vsel %vm616_vm2, %v1729_v3, 0.0 }
 0x4b0   : > { %v1018_v6 = vsub.f32 %v1009_v53, %v1017_v4  ;;  %784 = vadd.xlane.f32.xlu0 %v783_v5 }
 0x4b2   : > { %v1019_v7 = vmul.f32 1.442695, %v1018_v6 }
 0x4b4   : > { %1730 = vpow2.f32 %v1019_v7 }
 0x4b5   : > { %1732 = vpow2.f32 %v900_v13 }
 0x4b9   : > { %675 = vrot.lane.b32.xlu1 %v2258_v25, %s1955_s24 }
 0x4be   : > { %v1731_v9 = vpop.eup %1730 }
 0x4bf   : > { %v1021_v10 = vsel %vm616_vm2, %v1731_v9, 0.0  ;;  %v1733_v14 = vpop.eup %1732 }
 0x4c0   : > { %1022 = vadd.xlane.f32.xlu0 %v1021_v10  ;;  %v902_v15 = vsel %vm616_vm2, %v1733_v14, 0.0 }
 0x4d6   : > { %789 = vrot.lane.b32.xlu0 %v2258_v25, %s1956_s15 }
 0x4dd   : > { %903 = vadd.xlane.f32.xlu1 %v902_v15 }
 0x4ee   : > { %908 = vrot.lane.b32.xlu1 %v2258_v25, %s1957_s18 }
 0x4f2   : > { %1027 = vrot.lane.b32.xlu1 %v2258_v25, %s1958_s20 }
 0x535   : > { %v671_v16 = vpop.xlane.xlu1 %670 }
 0x536   : > { %1734 = vrcp.f32 %v671_v16 }
 0x539   : > { %v676_v17 = vpop.permute.xlu1 %675 }
 0x53a   : > { %v682_v18 = vsel %vm680_vm3, %v676_v17, 0  ;;  %v1718_v17 = vld [vmem:[%s2380_s9] sm:$0xff]  }
 0x53b   : > { %1560 = vmatpush3.bf16.msra.mxu0 %v682_v18 }
 0x53c   : > { %1571 = vmatprep.subr.bf16.mxu0 %v1946_v8 }
 0x53d   : > { %v785_v20 = vpop.xlane.xlu0 %784 }
 0x53e   : > { %1736 = vrcp.f32 %v785_v20 }
 0x540   : > { %v1735_v19 = vpop.eup %1734 }
 0x541   : > { %v673_v21 = vmul.f32 %v1735_v19, %v1727_v1 }
 0x543   : > { %v674_v22 = vpack.c.bf16 %v673_v21, %v673_v21 }
 0x545   : > { %1562 = vmatmul.mubr.msk.bf16.vlgmr.msra.gmra.mrb[4].mxu0 %vm616_vm2, %v674_v22  ;;  %v1498_v22 = vld [vmem:[#allocation7] ss:$0 sm:$0xff] }
 0x546   : > { %1573 = vmatprep.mubr.msk.bf16.mxu0 %vm1947_vm1, %v1946_v8 }
 0x548   : > { %v1737_v23 = vpop.eup %1736 }
 0x549   : > { %v787_v25 = vmul.f32 %v1737_v23, %v1729_v3  ;;  %v1494_v3 = vld [vmem:[#allocation5] ss:$0 sm:$0xff] }
 0x54b   : > { %v788_v28 = vpack.c.bf16 %v787_v25, %v787_v25 }
 0x54d   : > { %v1023_v24 = vpop.xlane.xlu0 %1022 }
 0x551   : > { %v790_v26 = vpop.permute.xlu0 %789 }
 0x552   : > { %v795_v27 = vsel %vm680_vm3, %v790_v26, 0 }
 0x553   : > { %1572 = vmatpush3.bf16.msra.mxu0 %v795_v27 }
 0x554   : > { %1583 = vmatprep.subr.bf16.mxu0 %v1946_v8 }
 0x556   : > { %1574 = vmatmul.mubr.msk.bf16.vlgmr.msra.gmra.mrb[8].mxu0 %vm616_vm2, %v788_v28  ;;  %v1720_v28 = vld [vmem:[%s2382_s11] sm:$0xff]  }
 0x557   : > { %1585 = vmatprep.mubr.msk.bf16.mxu0 %vm1947_vm1, %v1946_v8 }
 0x56a   : > { %v904_v29 = vpop.xlane.xlu1 %903 }
 0x56b   : > { %1738 = vrcp.f32 %v904_v29  ;;  %v1721_v29 = vld [vmem:[%s2382_s11 + $0x8] sm:$0xff]  }
 0x56c   : > { %1740 = vrcp.f32 %v1023_v24  ;;  %v1499_v24 = vld [vmem:[#allocation8] ss:$0 sm:$0xff] }
 0x56e   : > { %v909_v30 = vpop.permute.xlu1 %908 }
 0x56f   : > { %v914_v31 = vsel %vm680_vm3, %v909_v30, 0  ;;  %v1722_v30 = vld [vmem:[%s2382_s11 + $0x10] sm:$0xff]  }
 0x570   : > { %1584 = vmatpush3.bf16.msra.mxu0 %v914_v31  ;;  %v1723_v31 = vld [vmem:[%s2382_s11 + $0x18] sm:$0xff]  }
 0x571   : > { %1595 = vmatprep.subr.bf16.mxu0 %v1946_v8 }
 0x572   : > { %v1028_v34 = vpop.permute.xlu1 %1027 }
 0x573   : > { %v1033_v37 = vsel %vm680_vm3, %v1028_v34, 0 }
 0x575   : > { %v1739_v32 = vpop.eup %1738 }
 0x576   : > { %v906_v33 = vmul.f32 %v1739_v32, %v1733_v14  ;;  %v1741_v36 = vpop.eup %1740  ;;  %v1500_v32 = vld [vmem:[#allocation10] ss:$0 sm:$0xff] }
 0x577   : > { %v1025_v38 = vmul.f32 %v1741_v36, %v1731_v9 }
 0x578   : > { %v907_v35 = vpack.c.bf16 %v906_v33, %v906_v33 }
 0x579   : > { %v1026_v39 = vpack.c.bf16 %v1025_v38, %v1025_v38 }
 0x57a   : > { %1586 = vmatmul.mubr.msk.bf16.vlgmr.msra.gmra.mrb[12].mxu0 %vm616_vm2, %v907_v35 }
 0x57b   : > { %1596 = vmatpush3.bf16.msra.mxu0 %v1033_v37  ;;  %1597 = vmatprep.mubr.msk.bf16.mxu0 %vm1947_vm1, %v1946_v8 }
 0x57c   : > { %1609 = vmatprep.subr.bf16.mxu0 %v1946_v8 }
 0x582   : > { %1598 = vmatmul.mubr.msk.bf16.vlgmr.msra.gmra.mrb[16].mxu0 %vm616_vm2, %v1026_v39 }
 0x583   : > { %1613 = vmatprep.mubr.msk.bf16.mxu0 %vm1947_vm1, %v1946_v8  ;;  %1610 = vmatpush3.bf16.msra.mxu0 %v1718_v17 }
 0x584   : > { %1611 = vmatprep.subr.bf16.mxu0 %v1946_v8 }
 0x618   : > { %v718_v40 = vpop.f32.mrb[4].mxu0 }
 0x619   : > { %v724_v41 = vpack.c.bf16 %v718_v40, %v718_v40  ;;  %v1563_v42 = vpop.f32.mrb[5].mxu0 }
 0x61a   : > { %v721_v43 = vpop.f32.mrb[6].mxu0 }
 0x61b   : > { %726 = vst.msk [vmem:[#allocation2] sm:$0xf] %vm725_vm4, %v724_v41  ;;  %v1564_v44 = vpop.f32.mrb[7].mxu0 }
 0x629   : > { %v831_v45 = vpop.f32.mrb[8].mxu0 }
 0x62a   : > { %v1512_v46 = vpack.c.bf16 %v831_v45, %v831_v45  ;;  %v1575_v47 = vpop.f32.mrb[9].mxu0 }
 0x62b   : > { %v834_v48 = vpop.f32.mrb[10].mxu0 }
 0x62c   : > { %841 = vrot.lane.b32.xlu0 %v1512_v46, %s1959_s27  ;;  %v1576_v49 = vpop.f32.mrb[11].mxu0  ;;  %v1504_v48 = vld [vmem:[#allocation11] ss:$0 sm:$0xff] }
 0x64d   : > { %v950_v51 = vpop.f32.mrb[12].mxu0 }
 0x64e   : > { %v1513_v53 = vpack.c.bf16 %v950_v51, %v950_v51  ;;  %v1587_v54 = vpop.f32.mrb[13].mxu0 }
 0x64f   : > { %v953_v55 = vpop.f32.mrb[14].mxu0 }
 0x650   : > { %960 = vrot.lane.b32.xlu1 %v1513_v53, %s1960_s23  ;;  %v1588_v56 = vpop.f32.mrb[15].mxu0 }
 0x655   : > { %v1069_v57 = vpop.f32.mrb[16].mxu0 }
 0x656   : > { %v1514_v58 = vpack.c.bf16 %v1069_v57, %v1069_v57  ;;  %v1599_v59 = vpop.f32.mrb[17].mxu0 }
 0x657   : > { %v1072_v60 = vpop.f32.mrb[18].mxu0 }
 0x658   : > { %1079 = vrot.lane.b32.xlu0 %v1514_v58, %s1961_s21  ;;  %v1600_v61 = vpop.f32.mrb[19].mxu0  ;;  %s511_s21 = scalar_lea.vmem %s2384_s13, %s1475_s29 }
 0x69e   : > { %v842_v62 = vpop.permute.xlu0 %841 }
 0x69f   : > { %845 = vst.msk [vmem:[#allocation2] sm:$0xf] %vm844_vm5, %v842_v62 }
 0x6c2   : > { %v961_v63 = vpop.permute.xlu1 %960 }
 0x6c3   : > { %964 = vst.msk [vmem:[#allocation2] sm:$0xf] %vm963_vm6, %v961_v63 }
 0x6ca   : > { %v1080_v1 = vpop.permute.xlu0 %1079 }
 0x6cb   : > { %1083 = vst.msk [vmem:[#allocation2] sm:$0xf] %vm1082_vm7, %v1080_v1 }
 0x6d2   : > { %v1084_v2 = vld [vmem:[#allocation2] sm:$0xf] }
 0x6d3   : > { %1606 = vmatmul.mubr.msk.bf16.vlgmr.msra.gmra.mrb[16].mxu1 %vm516_vm0, %v1084_v2 }
 0x6d4   : > { %1625 = vmatprep.mubr.msk.bf16.mxu1 %vm1947_vm1, %v1946_v8  ;;  %1618 = vmatpush3.bf16.msra.mxu1 %v1720_v28 }
 0x6d5   : > { %1619 = vmatprep.subr.bf16.mxu1 %v1946_v8 }
 0x6d8   : > { %1620 = vmatpush3.bf16.msra.mxu1 %v1721_v29 }
 0x6d9   : > { %1621 = vmatprep.subr.bf16.mxu1 %v1946_v8 }
 0x6dc   : > { %1622 = vmatpush3.bf16.msra.mxu1 %v1722_v30 }
 0x6dd   : > { %1623 = vmatprep.subr.bf16.mxu1 %v1946_v8 }
 0x6e0   : > { %1624 = vmatpush3.bf16.msra.mxu1 %v1723_v31 }
 0x7a6   : > { %v1145_v4 = vpop.f32.mrb[16].mxu1 }
 0x7a7   : > { %v1146_v5 = vadd.f32 %v1494_v3, %v1145_v4  ;;  %v1607_v6 = vpop.f32.mrb[17].mxu1 }
 0x7a8   : > { %v1148_v7 = vpop.f32.mrb[18].mxu1 }
 0x7a9   : > { %v2332_v9 = vadd.f32 %v1146_v5, %v2229_v0  ;;  %v1608_v10 = vpop.f32.mrb[19].mxu1  ;;  %v1719_v0 = vld [vmem:[%s2380_s9 + $0x8] sm:$0xff]  }
 0x7aa   : > { %1612 = vmatpush3.bf16.msra.mxu0 %v1719_v0 }
 0x7ab   : > { %v1154_v11 = vsel %vm516_vm0, %v2332_v9, 0.0 }
 0x7ac   : > { %1155 = vadd.xlane.f32.xlu1 %v1154_v11 }
 0x839   : > { %v1156_v12 = vpop.xlane.xlu1 %1155 }
 0x83a   : > { %v1157_v13 = vmul.f32 0.03125, %v1156_v12 }
 0x83c   : > { %v1158_v14 = vsub.f32 %v2332_v9, %v1157_v13 }
 0x83e   : > { %v1159_v15 = vmul.f32 %v1158_v14, %v1158_v14 }
 0x840   : > { %v1160_v16 = vsel %vm516_vm0, %v1159_v15, 0.0 }
 0x841   : > { %1161 = vadd.xlane.f32.xlu0 %v1160_v16 }
 0x8ce   : > { %v1162_v18 = vpop.xlane.xlu0 %1161 }
 0x8cf   : > { %v1163_v19 = vmul.f32 0.03125, %v1162_v18 }
 0x8d1   : > { %v1164_v20 = vadd.f32 1e-05, %v1163_v19 }
 0x8d3   : > { %1742 = vrsqrt.f32 %v1164_v20 }
 0x8dd   : > { %v1743_v21 = vpop.eup %1742 }
 0x8de   : > { %v1166_v23 = vmul.f32 %v1743_v21, %v1158_v14 }
 0x8e0   : > { %v1173_v25 = vmul.f32 %v1498_v22, %v1166_v23 }
 0x8e2   : > { %v1180_v26 = vadd.f32 %v1499_v24, %v1173_v25 }
 0x8e4   : > { %v1181_v27 = vpack.c.bf16 %v1180_v26, %v1180_v26 }
 0x8e6   : > { %1614 = vmatmul.mubr.msk.bf16.vlgmr.msra.gmra.mrb[20].mxu0 %vm516_vm0, %v1181_v27 }
 0x9b9   : > { %v1242_v33 = vpop.f32.mrb[20].mxu0 }
 0x9ba   : > { %v1243_v34 = vadd.f32 %v1500_v32, %v1242_v33  ;;  %v1615_v35 = vpop.f32.mrb[21].mxu0 }
 0x9bb   : > { %v1245_v36 = vpop.f32.mrb[22].mxu0 }
 0x9bc   : > { %v1248_v37 = vmul.f32 1.702, %v1243_v34  ;;  %v1616_v38 = vpop.f32.mrb[23].mxu0 }
 0x9be   : > { %v1249_v39 = vand.u32 2147483647, %v1248_v37  ;;  %vm1255_vm8 = vcmp.ge.f32.partialorder %v1248_v37, 0.0 }
 0x9c0   : > { %v1250_v40 = vsub.f32 0.0, %v1249_v39 }
 0x9c2   : > { %v1251_v41 = vmul.f32 1.442695, %v1250_v40 }
 0x9c4   : > { %1744 = vpow2.f32 %v1251_v41 }
 0x9ce   : > { %v1745_v42 = vpop.eup %1744 }
 0x9cf   : > { %v1253_v43 = vadd.f32 1.0, %v1745_v42 }
 0x9d1   : > { %1746 = vrcp.f32 %v1253_v43 }
 0x9db   : > { %v1747_v8 = vpop.eup %1746 }
 0x9dc   : > { %v1256_v44 = vmul.f32 %v1747_v8, %v1745_v42 }
 0x9de   : > { %v1257_v45 = vsel %vm1255_vm8, %v1747_v8, %v1256_v44 }
 0x9df   : > { %v1258_v46 = vmul.f32 %v1257_v45, %v1243_v34 }
 0x9e1   : > { %v1259_v47 = vpack.c.bf16 %v1258_v46, %v1258_v46 }
 0x9e3   : > { %1626 = vmatmul.mubr.msk.bf16.vlgmr.msra.gmra.mrb[20].mxu1 %vm1299_vm9, %v1259_v47 }
 0xab6   : > { %v1337_v49 = vpop.f32.mrb[20].mxu1 }
 0xab7   : > { %v1338_v50 = vadd.f32 %v1504_v48, %v1337_v49  ;;  %v1627_v51 = vpop.f32.mrb[21].mxu1 }
 0xab8   : > { %v1340_v52 = vpop.f32.mrb[22].mxu1 }
 0xab9   : > { %v1343_v53 = vadd.f32 %v1338_v50, %v2332_v9  ;;  %v1628_v54 = vpop.f32.mrb[23].mxu1 }
 0xabb   : > { %1344 = vst.msk [vmem:[%s511_s21] sm:$0xff] %vm516_vm0, %v1343_v53 }
 0xabc PF: > { %s2401_s22 = sld [smem:[#allocation17_spill]] }
 0xac2   : > { %s27_s25 = sadd.s32 1, %s2401_s22  }
 0xac3   : > { %p24_p11 = scmp.ge.s32.totalorder %s27_s25, 4  }
 0xac5   :  { %26 = sbr.rel (!%p24_p11) target bundleno = 4 (0x4), region = 127 }
 0xacc   :  { %1364 = vsyncpa [#allocation4], 1 }
 0xacd   :  { %1366 = vsyncpa [#allocation4 + $0x1], 1 }
 0xace   :  { %1367 = vsyncpa [#allocation6], 1 }
 0xacf   :  { %1368 = vsyncpa [#allocation9], 1 }
 0xad0   :  { %1369 = vsyncpa [#allocation12], 1 }

</bundles_post_ra>
